<compile_context>
chip_gen: v5e
topology: v5e:2x2
jax: 0.10.0
libtpu: 0.0.40
codegen_flags: <defaults>
</compile_context>

<pallas_src>
import jax
import jax.numpy as jnp
from jax.experimental import pallas as pl
from jax.experimental.pallas import tpu as pltpu

# ---------------- configuration (small synthetic shapes) ----------------
BATCH = 2
C_IN = 3
IMG = 16                 # configs.IMG_SIZE
PATCH = 4                # swin patch size
HP = WP = IMG // PATCH   # patch grid -> 4 x 4
N_TOK = HP * WP          # 16 tokens / image
EMBED = 32               # swin embed dim (global_feature_channels)
HEADS = 4
HEAD_DIM = EMBED // HEADS
MLP_HIDDEN = 4 * EMBED   # 128 (lane-dense)
NUM_CLASSES = 5          # configs.OUTPUT_NEURONS (DR grades)
PRCF_RATIO = 16          # prcf_reduction_ratio
PRCF_HIDDEN = max(EMBED // PRCF_RATIO, 1)
LANE = 128               # lane width for lane-dense padded head output
LN_EPS = 1e-5


# ---------------- small in-kernel helper ----------------

def _layernorm(x, g, b, eps=LN_EPS):
    x = x.astype(jnp.float32)
    mu = jnp.mean(x, axis=-1, keepdims=True)
    var = jnp.mean(jnp.square(x - mu), axis=-1, keepdims=True)
    return (x - mu) * jax.lax.rsqrt(var + eps) * g + b


# ---------------- the single fused kernel (Steps A-E, whole batch) ----------------

def _wsl_dr_kernel(pix_ref, pw_ref, pb_ref,
                   patch_w_ref, patch_b_ref, pe_g_ref, pe_b_ref,
                   pproj_w_ref, pproj_b_ref,
                   fc1_wt_ref, fc1_b_ref, fc2_w_ref, fc2_b_ref,
                   ln1_g_ref, ln1_b_ref, qkv_w_ref, qkv_b_ref,
                   head_mask_ref, attn_bias_ref,
                   proj_w_ref, proj_b_ref, ln2_g_ref, ln2_b_ref,
                   mlp_w1_ref, mlp_b1_ref, mlp_w2_ref, mlp_b2_ref,
                   nrm_g_ref, nrm_b_ref, head_w_ref, head_b_ref,
                   o_ref):
    P2 = PATCH * PATCH
    pix = pix_ref[...].astype(jnp.float32)             # (B*N_TOK, C_IN*P2)
    BN = pix.shape[0]
    B = BN // N_TOK

    c0 = pix[:, 0 * P2:1 * P2]
    c1 = pix[:, 1 * P2:2 * P2]
    c2 = pix[:, 2 * P2:3 * P2]

    # --- Step A: frozen 1x1-conv saliency + sigmoid gating (VPU/EUP only).
    # TODO(synk): the real model builds G via Grad-CAM over a frozen checkpoint CNN;
    # a frozen 1x1-conv saliency gating the image stands in.
    pw = pw_ref[...]                                    # (1, C_IN)
    heat = jax.nn.sigmoid(c0 * pw[:, 0:1] + c1 * pw[:, 1:2] + c2 * pw[:, 2:3]
                          + pb_ref[...])
    inv_p2 = 1.0 / P2
    gds0 = jnp.sum(c0 * heat, axis=-1, keepdims=True) * inv_p2
    gds1 = jnp.sum(c1 * heat, axis=-1, keepdims=True) * inv_p2
    gds2 = jnp.sum(c2 * heat, axis=-1, keepdims=True) * inv_p2
    pproj_w = pproj_w_ref[...]                          # (C_IN, EMBED)
    g_tok = (gds0 * pproj_w[0:1, :] + gds1 * pproj_w[1:2, :]
             + gds2 * pproj_w[2:3, :] + pproj_b_ref[...])            # (BN, EMBED)

    # --- Step B: patch embedding (bf16 MXU, f32 acc) + LayerNorm (f32)
    tok = jnp.dot(pix.astype(jnp.bfloat16), patch_w_ref[...],
                  preferred_element_type=jnp.float32) + patch_b_ref[...]
    tok = _layernorm(tok, pe_g_ref[...], pe_b_ref[...])

    # --- Step C: PRCF fusion + SE channel attention (per image, VPU/XLU only)
    fused = tok + g_tok                                 # (BN, EMBED)
    pooled = jnp.concatenate(
        [jnp.mean(fused[b * N_TOK:(b + 1) * N_TOK], axis=0, keepdims=True)
         for b in range(B)], axis=0)                    # (B, EMBED)
    fc1_wt = fc1_wt_ref[...]                            # (PRCF_HIDDEN, EMBED)
    fc2_w = fc2_w_ref[...]                              # (PRCF_HIDDEN, EMBED)
    se_pre = jnp.zeros((B, EMBED), jnp.float32) + fc2_b_ref[...]
    for j in range(PRCF_HIDDEN):                        # SE bottleneck on VPU/XLU
        hj = jnp.maximum(jnp.sum(pooled * fc1_wt[j:j + 1, :], axis=-1,
                                 keepdims=True) + fc1_b_ref[:, j:j + 1], 0.0)  # (B,1)
        se_pre = se_pre + hj * fc2_w[j:j + 1, :]
    gate = jax.nn.sigmoid(se_pre)                       # (B, EMBED)
    x = jnp.concatenate(
        [fused[b * N_TOK:(b + 1) * N_TOK] * gate[b:b + 1, :] for b in range(B)],
        axis=0)                                         # (BN, EMBED)

    # --- Step D: transformer block; all heads + all images in 3 MXU matmuls.
    # TODO(synk): full timm Swin stages (window shift, relative position bias, patch
    # merging, pretrained weights) are not reproducible here; one global MHSA+MLP
    # block at constant resolution stands in for the token-mixing hot path.
    y = _layernorm(x, ln1_g_ref[...], ln1_b_ref[...])
    qkv = jnp.dot(y.astype(jnp.bfloat16), qkv_w_ref[...],
                  preferred_element_type=jnp.float32) + qkv_b_ref[...]   # (BN, 3E)
    scale = 1.0 / (HEAD_DIM ** 0.5)
    q = qkv[:, 0:EMBED] * scale                         # scale folded into q
    k = qkv[:, EMBED:2 * EMBED]
    v = qkv[:, 2 * EMBED:3 * EMBED]

    head_mask = head_mask_ref[...]                      # (HEADS*BN, EMBED), 0/1
    k_big = (jnp.concatenate([k] * HEADS, axis=0) * head_mask).astype(jnp.bfloat16)
    v_big = (jnp.concatenate([v] * HEADS, axis=0) * head_mask).astype(jnp.bfloat16)

    # block scores: s[i, h*BN + m] = q_h[i] . k_h[m]
    s = jax.lax.dot_general(q.astype(jnp.bfloat16), k_big,
                            (((1,), (1,)), ((), ())),
                            preferred_element_type=jnp.float32)          # (BN, H*BN)
    s = s + attn_bias_ref[...]                          # -1e30 on cross-image pairs
    s = s - jnp.max(s, axis=-1, keepdims=True)          # shared shift cancels per block
    p = jnp.exp(s)
    p_bf = p.astype(jnp.bfloat16)
    num = jnp.dot(p_bf, v_big, preferred_element_type=jnp.float32)       # (BN, E)
    den = jnp.dot(p_bf, head_mask.astype(jnp.bfloat16),
                  preferred_element_type=jnp.float32)                    # (BN, E)
    attn = num * pl.reciprocal(den, approx=True)        # per-head softmax normalize (EUP)
    x = x + (jnp.dot(attn.astype(jnp.bfloat16), proj_w_ref[...],
                     preferred_element_type=jnp.float32) + proj_b_ref[...])

    # ---- MLP ----
    y = _layernorm(x, ln2_g_ref[...], ln2_b_ref[...])
    hdn = jnp.dot(y.astype(jnp.bfloat16), mlp_w1_ref[...],
                  preferred_element_type=jnp.float32) + mlp_b1_ref[...]
    # TODO(synk): PyTorch nn.GELU default is exact erf; tanh approximation used here.
    hdn = jax.nn.gelu(hdn, approximate=True)
    x = x + (jnp.dot(hdn.astype(jnp.bfloat16), mlp_w2_ref[...],
                     preferred_element_type=jnp.float32) + mlp_b2_ref[...])

    # --- Step E: final norm, per-image token mean-pool, DR head (lane-dense 128)
    y = _layernorm(x, nrm_g_ref[...], nrm_b_ref[...])
    pooled_tok = jnp.concatenate(
        [jnp.mean(y[b * N_TOK:(b + 1) * N_TOK], axis=0, keepdims=True)
         for b in range(B)], axis=0)                    # (B, EMBED)
    logits = jnp.dot(pooled_tok.astype(jnp.bfloat16), head_w_ref[...],
                     preferred_element_type=jnp.float32) + head_b_ref[...]  # (B, LANE)
    o_ref[...] = logits.astype(o_ref.dtype)


# ---------------- wrapper: one gridless pallas_call for the whole forward -------

def wsl_dr_fused_call(patches_flat, p):
    BN = patches_flat.shape[0]
    B = BN // N_TOK
    HBN = HEADS * BN

    # Constant attention masks (traced once; XLA constant-folds them).
    q_img = jnp.arange(BN) // N_TOK
    k_img = (jnp.arange(HBN) % BN) // N_TOK
    attn_bias = jnp.where(q_img[:, None] == k_img[None, :],
                          jnp.float32(0.0), jnp.float32(-1e30))          # (BN, H*BN)
    j_head = jnp.arange(HBN) // BN
    e_head = jnp.arange(EMBED) // HEAD_DIM
    head_mask = (j_head[:, None] == e_head[None, :]).astype(jnp.float32)  # (H*BN, E)

    head_w_pad = jnp.pad(p["head_w"], ((0, 0), (0, LANE - NUM_CLASSES)))  # (E, LANE)
    head_b_pad = jnp.pad(p["head_b"], (0, LANE - NUM_CLASSES)).reshape(1, LANE)

    args = [
        patches_flat,                                                   # (BN, C_IN*P*P)
        p["prompt_w"].reshape(1, C_IN), p["prompt_b"].reshape(1, 1),
        p["patch_w"].astype(jnp.bfloat16), p["patch_b"].reshape(1, EMBED),
        p["patch_ln_g"].reshape(1, EMBED), p["patch_ln_b"].reshape(1, EMBED),
        p["prcf_proj_w"], p["prcf_proj_b"].reshape(1, EMBED),
        p["prcf_fc1_w"].T, p["prcf_fc1_b"].reshape(1, PRCF_HIDDEN),
        p["prcf_fc2_w"], p["prcf_fc2_b"].reshape(1, EMBED),
        p["ln1_g"].reshape(1, EMBED), p["ln1_b"].reshape(1, EMBED),
        p["qkv_w"].astype(jnp.bfloat16), p["qkv_b"].reshape(1, 3 * EMBED),
        head_mask, attn_bias,
        p["proj_w"].astype(jnp.bfloat16), p["proj_b"].reshape(1, EMBED),
        p["ln2_g"].reshape(1, EMBED), p["ln2_b"].reshape(1, EMBED),
        p["mlp_w1"].astype(jnp.bfloat16), p["mlp_b1"].reshape(1, MLP_HIDDEN),
        p["mlp_w2"].astype(jnp.bfloat16), p["mlp_b2"].reshape(1, EMBED),
        p["norm_g"].reshape(1, EMBED), p["norm_b"].reshape(1, EMBED),
        head_w_pad.astype(jnp.bfloat16), head_b_pad,
    ]
    vmem = pl.BlockSpec(memory_space=pltpu.MemorySpace.VMEM)
    out = pl.pallas_call(
        _wsl_dr_kernel,
        out_shape=jax.ShapeDtypeStruct((B, LANE), jnp.float32),
        in_specs=[vmem] * len(args),
        out_specs=vmem,
    )(*args)
    return out[:, :NUM_CLASSES]                                          # (B, NUM_CLASSES)


# ---------------- parameter construction (deterministic) ----------------

def init_params():
    key = jax.random.PRNGKey(42)
    ks = list(jax.random.split(key, 16))

    def w(k, shape, scale=0.02):
        return (scale * jax.random.normal(k, shape)).astype(jnp.float32)

    return {
        # Step A: frozen prompt-CNN stand-in (1x1 conv 3 -> 1)
        "prompt_w": w(ks[0], (C_IN, 1)),
        "prompt_b": jnp.zeros((1,), jnp.float32),
        # Step B: patch-embed projection + norm
        "patch_w": w(ks[1], (C_IN * PATCH * PATCH, EMBED)),
        "patch_b": jnp.zeros((EMBED,), jnp.float32),
        "patch_ln_g": jnp.ones((EMBED,), jnp.float32),
        "patch_ln_b": jnp.zeros((EMBED,), jnp.float32),
        # Step C: PRCF encoder (prompt projection + channel-fusion SE)
        "prcf_proj_w": w(ks[2], (C_IN, EMBED)),
        "prcf_proj_b": jnp.zeros((EMBED,), jnp.float32),
        "prcf_fc1_w": w(ks[3], (EMBED, PRCF_HIDDEN)),
        "prcf_fc1_b": jnp.zeros((PRCF_HIDDEN,), jnp.float32),
        "prcf_fc2_w": w(ks[4], (PRCF_HIDDEN, EMBED)),
        "prcf_fc2_b": jnp.zeros((EMBED,), jnp.float32),
        # Step D: transformer block (stand-in for Swin stages)
        "ln1_g": jnp.ones((EMBED,), jnp.float32),
        "ln1_b": jnp.zeros((EMBED,), jnp.float32),
        "qkv_w": w(ks[5], (EMBED, 3 * EMBED)),
        "qkv_b": jnp.zeros((3 * EMBED,), jnp.float32),
        "proj_w": w(ks[6], (EMBED, EMBED)),
        "proj_b": jnp.zeros((EMBED,), jnp.float32),
        "ln2_g": jnp.ones((EMBED,), jnp.float32),
        "ln2_b": jnp.zeros((EMBED,), jnp.float32),
        "mlp_w1": w(ks[7], (EMBED, MLP_HIDDEN)),
        "mlp_b1": jnp.zeros((MLP_HIDDEN,), jnp.float32),
        "mlp_w2": w(ks[8], (MLP_HIDDEN, EMBED)),
        "mlp_b2": jnp.zeros((EMBED,), jnp.float32),
        # Step E: final norm + DR head
        "norm_g": jnp.ones((EMBED,), jnp.float32),
        "norm_b": jnp.zeros((EMBED,), jnp.float32),
        "head_w": w(ks[9], (EMBED, NUM_CLASSES)),
        "head_b": jnp.zeros((NUM_CLASSES,), jnp.float32),
    }


# ---------------- forward pass ----------------

def wsl_dr_forward(x_nchw, params):
    B = x_nchw.shape[0]
    # Host-side layout only: NCHW -> (B*N_TOK, C_IN*PATCH*PATCH) with (c, ph, pw)
    # flattening (matches the Conv2d patch-embed weight flatten order).
    # TODO(synk): fold this transpose into the kernel's input layout if BATCH grows.
    patches = x_nchw.reshape(B, C_IN, HP, PATCH, WP, PATCH)
    patches = patches.transpose(0, 2, 4, 1, 3, 5).reshape(
        B * N_TOK, C_IN * PATCH * PATCH)
    return wsl_dr_fused_call(patches, params)           # (B, NUM_CLASSES)


# ---------------- main ----------------

if __name__ == "__main__":
    key = jax.random.PRNGKey(0)
    x = jax.random.normal(key, (BATCH, C_IN, IMG, IMG), dtype=jnp.float32)  # NCHW
    params = init_params()

    fwd = jax.jit(wsl_dr_forward)
    logits = fwd(x, params)
    jax.block_until_ready(logits)
    assert logits.shape == (BATCH, NUM_CLASSES), logits.shape
    print("KERNEL_OK")
</pallas_src>

<mosaic_0001>
module attributes {stable_mosaic.version = 11 : i64} {
  func.func @_wsl_dr_kernel(%arg0: memref<32x48xf32, #tpu.memory_space<vmem>>, %arg1: memref<1x3xf32, #tpu.memory_space<vmem>>, %arg2: memref<1x1xf32, #tpu.memory_space<vmem>>, %arg3: memref<48x32xbf16, #tpu.memory_space<vmem>>, %arg4: memref<1x32xf32, #tpu.memory_space<vmem>>, %arg5: memref<1x32xf32, #tpu.memory_space<vmem>>, %arg6: memref<1x32xf32, #tpu.memory_space<vmem>>, %arg7: memref<3x32xf32, #tpu.memory_space<vmem>>, %arg8: memref<1x32xf32, #tpu.memory_space<vmem>>, %arg9: memref<2x32xf32, #tpu.memory_space<vmem>>, %arg10: memref<1x2xf32, #tpu.memory_space<vmem>>, %arg11: memref<2x32xf32, #tpu.memory_space<vmem>>, %arg12: memref<1x32xf32, #tpu.memory_space<vmem>>, %arg13: memref<1x32xf32, #tpu.memory_space<vmem>>, %arg14: memref<1x32xf32, #tpu.memory_space<vmem>>, %arg15: memref<32x96xbf16, #tpu.memory_space<vmem>>, %arg16: memref<1x96xf32, #tpu.memory_space<vmem>>, %arg17: memref<128x32xf32, #tpu.memory_space<vmem>>, %arg18: memref<32x128xf32, #tpu.memory_space<vmem>>, %arg19: memref<32x32xbf16, #tpu.memory_space<vmem>>, %arg20: memref<1x32xf32, #tpu.memory_space<vmem>>, %arg21: memref<1x32xf32, #tpu.memory_space<vmem>>, %arg22: memref<1x32xf32, #tpu.memory_space<vmem>>, %arg23: memref<32x128xbf16, #tpu.memory_space<vmem>>, %arg24: memref<1x128xf32, #tpu.memory_space<vmem>>, %arg25: memref<128x32xbf16, #tpu.memory_space<vmem>>, %arg26: memref<1x32xf32, #tpu.memory_space<vmem>>, %arg27: memref<1x32xf32, #tpu.memory_space<vmem>>, %arg28: memref<1x32xf32, #tpu.memory_space<vmem>>, %arg29: memref<32x128xbf16, #tpu.memory_space<vmem>>, %arg30: memref<1x128xf32, #tpu.memory_space<vmem>>, %arg31: memref<2x128xf32, #tpu.memory_space<vmem>>) attributes {dimension_semantics = [], scalar_prefetch = 0 : i64, scratch_operands = 0 : i64, tpu.core_type = #tpu.core_type<tc>} {
    %c0 = arith.constant 0 : index
    %c0_0 = arith.constant 0 : index
    %0 = vector.load %arg0[%c0, %c0_0] : memref<32x48xf32, #tpu.memory_space<vmem>>, vector<32x48xf32>
    %1 = vector.extract_strided_slice %0 {offsets = [0, 0], sizes = [32, 16], strides = [1, 1]} : vector<32x48xf32> to vector<32x16xf32>
    %2 = vector.extract_strided_slice %0 {offsets = [0, 16], sizes = [32, 16], strides = [1, 1]} : vector<32x48xf32> to vector<32x16xf32>
    %3 = vector.extract_strided_slice %0 {offsets = [0, 32], sizes = [32, 16], strides = [1, 1]} : vector<32x48xf32> to vector<32x16xf32>
    %c0_1 = arith.constant 0 : index
    %c0_2 = arith.constant 0 : index
    %4 = vector.load %arg1[%c0_1, %c0_2] : memref<1x3xf32, #tpu.memory_space<vmem>>, vector<1x3xf32>
    %5 = vector.extract_strided_slice %4 {offsets = [0, 0], sizes = [1, 1], strides = [1, 1]} : vector<1x3xf32> to vector<1x1xf32>
    %6 = vector.broadcast %5 : vector<1x1xf32> to vector<32x16xf32>
    %7 = arith.mulf %1, %6 : vector<32x16xf32>
    %8 = vector.extract_strided_slice %4 {offsets = [0, 1], sizes = [1, 1], strides = [1, 1]} : vector<1x3xf32> to vector<1x1xf32>
    %9 = vector.broadcast %8 : vector<1x1xf32> to vector<32x16xf32>
    %10 = arith.mulf %2, %9 : vector<32x16xf32>
    %11 = arith.addf %7, %10 : vector<32x16xf32>
    %12 = vector.extract_strided_slice %4 {offsets = [0, 2], sizes = [1, 1], strides = [1, 1]} : vector<1x3xf32> to vector<1x1xf32>
    %13 = vector.broadcast %12 : vector<1x1xf32> to vector<32x16xf32>
    %14 = arith.mulf %3, %13 : vector<32x16xf32>
    %15 = arith.addf %11, %14 : vector<32x16xf32>
    %c0_3 = arith.constant 0 : index
    %c0_4 = arith.constant 0 : index
    %16 = vector.load %arg2[%c0_3, %c0_4] : memref<1x1xf32, #tpu.memory_space<vmem>>, vector<1x1xf32>
    %17 = vector.broadcast %16 : vector<1x1xf32> to vector<32x16xf32>
    %18 = arith.addf %15, %17 : vector<32x16xf32>
    %19 = arith.negf %18 : vector<32x16xf32>
    %20 = math.exp %19 : vector<32x16xf32>
    %cst = arith.constant 1.000000e+00 : f32
    %21 = vector.broadcast %cst : f32 to vector<32x16xf32>
    %22 = arith.addf %21, %20 : vector<32x16xf32>
    %23 = arith.divf %21, %22 : vector<32x16xf32>
    %24 = arith.mulf %1, %23 : vector<32x16xf32>
    %cst_5 = arith.constant dense<0.000000e+00> : vector<32xf32>
    %25 = vector.multi_reduction <add>, %24, %cst_5 [1] : vector<32x16xf32> to vector<32xf32>
    %26 = vector.shape_cast %25 : vector<32xf32> to vector<32x1xf32>
    %cst_6 = arith.constant 6.250000e-02 : f32
    %27 = vector.broadcast %cst_6 : f32 to vector<32x1xf32>
    %28 = arith.mulf %26, %27 : vector<32x1xf32>
    %29 = arith.mulf %2, %23 : vector<32x16xf32>
    %cst_7 = arith.constant dense<0.000000e+00> : vector<32xf32>
    %30 = vector.multi_reduction <add>, %29, %cst_7 [1] : vector<32x16xf32> to vector<32xf32>
    %31 = vector.shape_cast %30 : vector<32xf32> to vector<32x1xf32>
    %cst_8 = arith.constant 6.250000e-02 : f32
    %32 = vector.broadcast %cst_8 : f32 to vector<32x1xf32>
    %33 = arith.mulf %31, %32 : vector<32x1xf32>
    %34 = arith.mulf %3, %23 : vector<32x16xf32>
    %cst_9 = arith.constant dense<0.000000e+00> : vector<32xf32>
    %35 = vector.multi_reduction <add>, %34, %cst_9 [1] : vector<32x16xf32> to vector<32xf32>
    %36 = vector.shape_cast %35 : vector<32xf32> to vector<32x1xf32>
    %cst_10 = arith.constant 6.250000e-02 : f32
    %37 = vector.broadcast %cst_10 : f32 to vector<32x1xf32>
    %38 = arith.mulf %36, %37 : vector<32x1xf32>
    %c0_11 = arith.constant 0 : index
    %c0_12 = arith.constant 0 : index
    %39 = vector.load %arg7[%c0_11, %c0_12] : memref<3x32xf32, #tpu.memory_space<vmem>>, vector<3x32xf32>
    %40 = vector.extract_strided_slice %39 {offsets = [0, 0], sizes = [1, 32], strides = [1, 1]} : vector<3x32xf32> to vector<1x32xf32>
    %41 = vector.broadcast %28 : vector<32x1xf32> to vector<32x32xf32>
    %42 = vector.broadcast %40 : vector<1x32xf32> to vector<32x32xf32>
    %43 = arith.mulf %41, %42 : vector<32x32xf32>
    %44 = vector.extract_strided_slice %39 {offsets = [1, 0], sizes = [1, 32], strides = [1, 1]} : vector<3x32xf32> to vector<1x32xf32>
    %45 = vector.broadcast %33 : vector<32x1xf32> to vector<32x32xf32>
    %46 = vector.broadcast %44 : vector<1x32xf32> to vector<32x32xf32>
    %47 = arith.mulf %45, %46 : vector<32x32xf32>
    %48 = arith.addf %43, %47 : vector<32x32xf32>
    %49 = vector.extract_strided_slice %39 {offsets = [2, 0], sizes = [1, 32], strides = [1, 1]} : vector<3x32xf32> to vector<1x32xf32>
    %50 = vector.broadcast %38 : vector<32x1xf32> to vector<32x32xf32>
    %51 = vector.broadcast %49 : vector<1x32xf32> to vector<32x32xf32>
    %52 = arith.mulf %50, %51 : vector<32x32xf32>
    %53 = arith.addf %48, %52 : vector<32x32xf32>
    %c0_13 = arith.constant 0 : index
    %c0_14 = arith.constant 0 : index
    %54 = vector.load %arg8[%c0_13, %c0_14] : memref<1x32xf32, #tpu.memory_space<vmem>>, vector<1x32xf32>
    %55 = vector.broadcast %54 : vector<1x32xf32> to vector<32x32xf32>
    %56 = arith.addf %53, %55 : vector<32x32xf32>
    %57 = arith.truncf %0 : vector<32x48xf32> to vector<32x48xbf16>
    %c0_15 = arith.constant 0 : index
    %c0_16 = arith.constant 0 : index
    %58 = vector.load %arg3[%c0_15, %c0_16] : memref<48x32xbf16, #tpu.memory_space<vmem>>, vector<48x32xbf16>
    %cst_17 = arith.constant dense<0.000000e+00> : vector<32x32xf32>
    %59 = tpu.matmul %57, %58, %cst_17 {dimension_numbers = #tpu.dot_dimension_numbers<[1], [0], [0], [1], [0, 0, 1, 1], [], []>} : vector<32x48xbf16>, vector<48x32xbf16>, vector<32x32xf32> -> vector<32x32xf32>
    %c0_18 = arith.constant 0 : index
    %c0_19 = arith.constant 0 : index
    %60 = vector.load %arg4[%c0_18, %c0_19] : memref<1x32xf32, #tpu.memory_space<vmem>>, vector<1x32xf32>
    %61 = vector.broadcast %60 : vector<1x32xf32> to vector<32x32xf32>
    %62 = arith.addf %59, %61 : vector<32x32xf32>
    %c0_20 = arith.constant 0 : index
    %c0_21 = arith.constant 0 : index
    %63 = vector.load %arg5[%c0_20, %c0_21] : memref<1x32xf32, #tpu.memory_space<vmem>>, vector<1x32xf32>
    %c0_22 = arith.constant 0 : index
    %c0_23 = arith.constant 0 : index
    %64 = vector.load %arg6[%c0_22, %c0_23] : memref<1x32xf32, #tpu.memory_space<vmem>>, vector<1x32xf32>
    %cst_24 = arith.constant dense<0.000000e+00> : vector<32xf32>
    %65 = vector.multi_reduction <add>, %62, %cst_24 [1] : vector<32x32xf32> to vector<32xf32>
    %66 = vector.shape_cast %65 : vector<32xf32> to vector<32x1xf32>
    %cst_25 = arith.constant 3.200000e+01 : f32
    %67 = vector.broadcast %cst_25 : f32 to vector<32x1xf32>
    %68 = arith.divf %66, %67 : vector<32x1xf32>
    %69 = vector.broadcast %68 : vector<32x1xf32> to vector<32x32xf32>
    %70 = arith.subf %62, %69 : vector<32x32xf32>
    %71 = arith.mulf %70, %70 : vector<32x32xf32>
    %cst_26 = arith.constant dense<0.000000e+00> : vector<32xf32>
    %72 = vector.multi_reduction <add>, %71, %cst_26 [1] : vector<32x32xf32> to vector<32xf32>
    %73 = vector.shape_cast %72 : vector<32xf32> to vector<32x1xf32>
    %cst_27 = arith.constant 3.200000e+01 : f32
    %74 = vector.broadcast %cst_27 : f32 to vector<32x1xf32>
    %75 = arith.divf %73, %74 : vector<32x1xf32>
    %76 = vector.broadcast %68 : vector<32x1xf32> to vector<32x32xf32>
    %77 = arith.subf %62, %76 : vector<32x32xf32>
    %cst_28 = arith.constant 9.99999974E-6 : f32
    %78 = vector.broadcast %cst_28 : f32 to vector<32x1xf32>
    %79 = arith.addf %75, %78 : vector<32x1xf32>
    %80 = math.rsqrt %79 : vector<32x1xf32>
    %81 = vector.broadcast %80 : vector<32x1xf32> to vector<32x32xf32>
    %82 = arith.mulf %77, %81 : vector<32x32xf32>
    %83 = vector.broadcast %63 : vector<1x32xf32> to vector<32x32xf32>
    %84 = arith.mulf %82, %83 : vector<32x32xf32>
    %85 = vector.broadcast %64 : vector<1x32xf32> to vector<32x32xf32>
    %86 = arith.addf %84, %85 : vector<32x32xf32>
    %87 = arith.addf %86, %56 : vector<32x32xf32>
    %88 = vector.extract_strided_slice %87 {offsets = [0, 0], sizes = [16, 32], strides = [1, 1]} : vector<32x32xf32> to vector<16x32xf32>
    %cst_29 = arith.constant dense<0.000000e+00> : vector<32xf32>
    %89 = vector.multi_reduction <add>, %88, %cst_29 [0] : vector<16x32xf32> to vector<32xf32>
    %90 = vector.shape_cast %89 : vector<32xf32> to vector<1x32xf32>
    %cst_30 = arith.constant 1.600000e+01 : f32
    %91 = vector.broadcast %cst_30 : f32 to vector<1x32xf32>
    %92 = arith.divf %90, %91 : vector<1x32xf32>
    %93 = vector.extract_strided_slice %87 {offsets = [16, 0], sizes = [16, 32], strides = [1, 1]} : vector<32x32xf32> to vector<16x32xf32>
    %cst_31 = arith.constant dense<0.000000e+00> : vector<32xf32>
    %94 = vector.multi_reduction <add>, %93, %cst_31 [0] : vector<16x32xf32> to vector<32xf32>
    %95 = vector.shape_cast %94 : vector<32xf32> to vector<1x32xf32>
    %cst_32 = arith.constant 1.600000e+01 : f32
    %96 = vector.broadcast %cst_32 : f32 to vector<1x32xf32>
    %97 = arith.divf %95, %96 : vector<1x32xf32>
    %98 = tpu.concatenate %92, %97 in 0 : vector<1x32xf32>, vector<1x32xf32> -> vector<2x32xf32>
    %c0_33 = arith.constant 0 : index
    %c0_34 = arith.constant 0 : index
    %99 = vector.load %arg9[%c0_33, %c0_34] : memref<2x32xf32, #tpu.memory_space<vmem>>, vector<2x32xf32>
    %c0_35 = arith.constant 0 : index
    %c0_36 = arith.constant 0 : index
    %100 = vector.load %arg11[%c0_35, %c0_36] : memref<2x32xf32, #tpu.memory_space<vmem>>, vector<2x32xf32>
    %cst_37 = arith.constant 0.000000e+00 : f32
    %101 = vector.broadcast %cst_37 : f32 to vector<2x32xf32>
    %c0_38 = arith.constant 0 : index
    %c0_39 = arith.constant 0 : index
    %102 = vector.load %arg12[%c0_38, %c0_39] : memref<1x32xf32, #tpu.memory_space<vmem>>, vector<1x32xf32>
    %103 = vector.broadcast %102 : vector<1x32xf32> to vector<2x32xf32>
    %104 = arith.addf %101, %103 : vector<2x32xf32>
    %105 = vector.extract_strided_slice %99 {offsets = [0, 0], sizes = [1, 32], strides = [1, 1]} : vector<2x32xf32> to vector<1x32xf32>
    %106 = vector.broadcast %105 : vector<1x32xf32> to vector<2x32xf32>
    %107 = arith.mulf %98, %106 : vector<2x32xf32>
    %cst_40 = arith.constant dense<0.000000e+00> : vector<2xf32>
    %108 = vector.multi_reduction <add>, %107, %cst_40 [1] : vector<2x32xf32> to vector<2xf32>
    %109 = vector.shape_cast %108 : vector<2xf32> to vector<2x1xf32>
    %c0_41 = arith.constant 0 : index
    %c0_42 = arith.constant 0 : index
    %110 = vector.load %arg10[%c0_41, %c0_42] : memref<1x2xf32, #tpu.memory_space<vmem>>, vector<1x1xf32>
    %111 = vector.broadcast %110 : vector<1x1xf32> to vector<2x1xf32>
    %112 = arith.addf %109, %111 : vector<2x1xf32>
    %cst_43 = arith.constant 0.000000e+00 : f32
    %113 = vector.broadcast %cst_43 : f32 to vector<2x1xf32>
    %114 = arith.maximumf %112, %113 : vector<2x1xf32>
    %115 = vector.extract_strided_slice %100 {offsets = [0, 0], sizes = [1, 32], strides = [1, 1]} : vector<2x32xf32> to vector<1x32xf32>
    %116 = vector.broadcast %114 : vector<2x1xf32> to vector<2x32xf32>
    %117 = vector.broadcast %115 : vector<1x32xf32> to vector<2x32xf32>
    %118 = arith.mulf %116, %117 : vector<2x32xf32>
    %119 = arith.addf %104, %118 : vector<2x32xf32>
    %120 = vector.extract_strided_slice %99 {offsets = [1, 0], sizes = [1, 32], strides = [1, 1]} : vector<2x32xf32> to vector<1x32xf32>
    %121 = vector.broadcast %120 : vector<1x32xf32> to vector<2x32xf32>
    %122 = arith.mulf %98, %121 : vector<2x32xf32>
    %cst_44 = arith.constant dense<0.000000e+00> : vector<2xf32>
    %123 = vector.multi_reduction <add>, %122, %cst_44 [1] : vector<2x32xf32> to vector<2xf32>
    %124 = vector.shape_cast %123 : vector<2xf32> to vector<2x1xf32>
    %c0_45 = arith.constant 0 : index
    %c1 = arith.constant 1 : index
    %125 = vector.load %arg10[%c0_45, %c1] : memref<1x2xf32, #tpu.memory_space<vmem>>, vector<1x1xf32>
    %126 = vector.broadcast %125 : vector<1x1xf32> to vector<2x1xf32>
    %127 = arith.addf %124, %126 : vector<2x1xf32>
    %cst_46 = arith.constant 0.000000e+00 : f32
    %128 = vector.broadcast %cst_46 : f32 to vector<2x1xf32>
    %129 = arith.maximumf %127, %128 : vector<2x1xf32>
    %130 = vector.extract_strided_slice %100 {offsets = [1, 0], sizes = [1, 32], strides = [1, 1]} : vector<2x32xf32> to vector<1x32xf32>
    %131 = vector.broadcast %129 : vector<2x1xf32> to vector<2x32xf32>
    %132 = vector.broadcast %130 : vector<1x32xf32> to vector<2x32xf32>
    %133 = arith.mulf %131, %132 : vector<2x32xf32>
    %134 = arith.addf %119, %133 : vector<2x32xf32>
    %135 = arith.negf %134 : vector<2x32xf32>
    %136 = math.exp %135 : vector<2x32xf32>
    %cst_47 = arith.constant 1.000000e+00 : f32
    %137 = vector.broadcast %cst_47 : f32 to vector<2x32xf32>
    %138 = arith.addf %137, %136 : vector<2x32xf32>
    %139 = arith.divf %137, %138 : vector<2x32xf32>
    %140 = vector.extract_strided_slice %87 {offsets = [0, 0], sizes = [16, 32], strides = [1, 1]} : vector<32x32xf32> to vector<16x32xf32>
    %141 = vector.extract_strided_slice %139 {offsets = [0, 0], sizes = [1, 32], strides = [1, 1]} : vector<2x32xf32> to vector<1x32xf32>
    %142 = vector.broadcast %141 : vector<1x32xf32> to vector<16x32xf32>
    %143 = arith.mulf %140, %142 : vector<16x32xf32>
    %144 = vector.extract_strided_slice %87 {offsets = [16, 0], sizes = [16, 32], strides = [1, 1]} : vector<32x32xf32> to vector<16x32xf32>
    %145 = vector.extract_strided_slice %139 {offsets = [1, 0], sizes = [1, 32], strides = [1, 1]} : vector<2x32xf32> to vector<1x32xf32>
    %146 = vector.broadcast %145 : vector<1x32xf32> to vector<16x32xf32>
    %147 = arith.mulf %144, %146 : vector<16x32xf32>
    %148 = tpu.concatenate %143, %147 in 0 : vector<16x32xf32>, vector<16x32xf32> -> vector<32x32xf32>
    %c0_48 = arith.constant 0 : index
    %c0_49 = arith.constant 0 : index
    %149 = vector.load %arg13[%c0_48, %c0_49] : memref<1x32xf32, #tpu.memory_space<vmem>>, vector<1x32xf32>
    %c0_50 = arith.constant 0 : index
    %c0_51 = arith.constant 0 : index
    %150 = vector.load %arg14[%c0_50, %c0_51] : memref<1x32xf32, #tpu.memory_space<vmem>>, vector<1x32xf32>
    %cst_52 = arith.constant dense<0.000000e+00> : vector<32xf32>
    %151 = vector.multi_reduction <add>, %148, %cst_52 [1] : vector<32x32xf32> to vector<32xf32>
    %152 = vector.shape_cast %151 : vector<32xf32> to vector<32x1xf32>
    %cst_53 = arith.constant 3.200000e+01 : f32
    %153 = vector.broadcast %cst_53 : f32 to vector<32x1xf32>
    %154 = arith.divf %152, %153 : vector<32x1xf32>
    %155 = vector.broadcast %154 : vector<32x1xf32> to vector<32x32xf32>
    %156 = arith.subf %148, %155 : vector<32x32xf32>
    %157 = arith.mulf %156, %156 : vector<32x32xf32>
    %cst_54 = arith.constant dense<0.000000e+00> : vector<32xf32>
    %158 = vector.multi_reduction <add>, %157, %cst_54 [1] : vector<32x32xf32> to vector<32xf32>
    %159 = vector.shape_cast %158 : vector<32xf32> to vector<32x1xf32>
    %cst_55 = arith.constant 3.200000e+01 : f32
    %160 = vector.broadcast %cst_55 : f32 to vector<32x1xf32>
    %161 = arith.divf %159, %160 : vector<32x1xf32>
    %162 = vector.broadcast %154 : vector<32x1xf32> to vector<32x32xf32>
    %163 = arith.subf %148, %162 : vector<32x32xf32>
    %cst_56 = arith.constant 9.99999974E-6 : f32
    %164 = vector.broadcast %cst_56 : f32 to vector<32x1xf32>
    %165 = arith.addf %161, %164 : vector<32x1xf32>
    %166 = math.rsqrt %165 : vector<32x1xf32>
    %167 = vector.broadcast %166 : vector<32x1xf32> to vector<32x32xf32>
    %168 = arith.mulf %163, %167 : vector<32x32xf32>
    %169 = vector.broadcast %149 : vector<1x32xf32> to vector<32x32xf32>
    %170 = arith.mulf %168, %169 : vector<32x32xf32>
    %171 = vector.broadcast %150 : vector<1x32xf32> to vector<32x32xf32>
    %172 = arith.addf %170, %171 : vector<32x32xf32>
    %173 = arith.truncf %172 : vector<32x32xf32> to vector<32x32xbf16>
    %c0_57 = arith.constant 0 : index
    %c0_58 = arith.constant 0 : index
    %174 = vector.load %arg15[%c0_57, %c0_58] : memref<32x96xbf16, #tpu.memory_space<vmem>>, vector<32x96xbf16>
    %cst_59 = arith.constant dense<0.000000e+00> : vector<32x96xf32>
    %175 = tpu.matmul %173, %174, %cst_59 {dimension_numbers = #tpu.dot_dimension_numbers<[1], [0], [0], [1], [0, 0, 1, 1], [], []>} : vector<32x32xbf16>, vector<32x96xbf16>, vector<32x96xf32> -> vector<32x96xf32>
    %c0_60 = arith.constant 0 : index
    %c0_61 = arith.constant 0 : index
    %176 = vector.load %arg16[%c0_60, %c0_61] : memref<1x96xf32, #tpu.memory_space<vmem>>, vector<1x96xf32>
    %177 = vector.broadcast %176 : vector<1x96xf32> to vector<32x96xf32>
    %178 = arith.addf %175, %177 : vector<32x96xf32>
    %179 = vector.extract_strided_slice %178 {offsets = [0, 0], sizes = [32, 32], strides = [1, 1]} : vector<32x96xf32> to vector<32x32xf32>
    %cst_62 = arith.constant 0.353553385 : f32
    %180 = vector.broadcast %cst_62 : f32 to vector<32x32xf32>
    %181 = arith.mulf %179, %180 : vector<32x32xf32>
    %182 = vector.extract_strided_slice %178 {offsets = [0, 32], sizes = [32, 32], strides = [1, 1]} : vector<32x96xf32> to vector<32x32xf32>
    %183 = vector.extract_strided_slice %178 {offsets = [0, 64], sizes = [32, 32], strides = [1, 1]} : vector<32x96xf32> to vector<32x32xf32>
    %c0_63 = arith.constant 0 : index
    %c0_64 = arith.constant 0 : index
    %184 = vector.load %arg17[%c0_63, %c0_64] : memref<128x32xf32, #tpu.memory_space<vmem>>, vector<128x32xf32>
    %185 = tpu.concatenate %182, %182, %182, %182 in 0 : vector<32x32xf32>, vector<32x32xf32>, vector<32x32xf32>, vector<32x32xf32> -> vector<128x32xf32>
    %186 = arith.mulf %185, %184 : vector<128x32xf32>
    %187 = arith.truncf %186 : vector<128x32xf32> to vector<128x32xbf16>
    %188 = tpu.concatenate %183, %183, %183, %183 in 0 : vector<32x32xf32>, vector<32x32xf32>, vector<32x32xf32>, vector<32x32xf32> -> vector<128x32xf32>
    %189 = arith.mulf %188, %184 : vector<128x32xf32>
    %190 = arith.truncf %189 : vector<128x32xf32> to vector<128x32xbf16>
    %191 = arith.truncf %181 : vector<32x32xf32> to vector<32x32xbf16>
    %cst_65 = arith.constant dense<0.000000e+00> : vector<32x128xf32>
    %192 = tpu.matmul %191, %187, %cst_65 {dimension_numbers = #tpu.dot_dimension_numbers<[1], [1], [0], [0], [0, 0, 1, 0], [], []>} : vector<32x32xbf16>, vector<128x32xbf16>, vector<32x128xf32> -> vector<32x128xf32>
    %c0_66 = arith.constant 0 : index
    %c0_67 = arith.constant 0 : index
    %193 = vector.load %arg18[%c0_66, %c0_67] : memref<32x128xf32, #tpu.memory_space<vmem>>, vector<32x128xf32>
    %194 = arith.addf %192, %193 : vector<32x128xf32>
    %cst_68 = arith.constant dense<0xFF800000> : vector<32xf32>
    %195 = vector.multi_reduction <maximumf>, %194, %cst_68 [1] : vector<32x128xf32> to vector<32xf32>
    %196 = vector.shape_cast %195 : vector<32xf32> to vector<32x1xf32>
    %197 = vector.broadcast %196 : vector<32x1xf32> to vector<32x128xf32>
    %198 = arith.subf %194, %197 : vector<32x128xf32>
    %199 = math.exp %198 : vector<32x128xf32>
    %200 = arith.truncf %199 : vector<32x128xf32> to vector<32x128xbf16>
    %cst_69 = arith.constant dense<0.000000e+00> : vector<32x32xf32>
    %201 = tpu.matmul %200, %190, %cst_69 {dimension_numbers = #tpu.dot_dimension_numbers<[1], [0], [0], [1], [0, 0, 1, 1], [], []>} : vector<32x128xbf16>, vector<128x32xbf16>, vector<32x32xf32> -> vector<32x32xf32>
    %202 = arith.truncf %184 : vector<128x32xf32> to vector<128x32xbf16>
    %cst_70 = arith.constant dense<0.000000e+00> : vector<32x32xf32>
    %203 = tpu.matmul %200, %202, %cst_70 {dimension_numbers = #tpu.dot_dimension_numbers<[1], [0], [0], [1], [0, 0, 1, 1], [], []>} : vector<32x128xbf16>, vector<128x32xbf16>, vector<32x32xf32> -> vector<32x32xf32>
    %204 = tpu.reciprocal %203 {approx = true} : vector<32x32xf32> -> vector<32x32xf32>
    %205 = arith.mulf %201, %204 : vector<32x32xf32>
    %206 = arith.truncf %205 : vector<32x32xf32> to vector<32x32xbf16>
    %c0_71 = arith.constant 0 : index
    %c0_72 = arith.constant 0 : index
    %207 = vector.load %arg19[%c0_71, %c0_72] : memref<32x32xbf16, #tpu.memory_space<vmem>>, vector<32x32xbf16>
    %cst_73 = arith.constant dense<0.000000e+00> : vector<32x32xf32>
    %208 = tpu.matmul %206, %207, %cst_73 {dimension_numbers = #tpu.dot_dimension_numbers<[1], [0], [0], [1], [0, 0, 1, 1], [], []>} : vector<32x32xbf16>, vector<32x32xbf16>, vector<32x32xf32> -> vector<32x32xf32>
    %c0_74 = arith.constant 0 : index
    %c0_75 = arith.constant 0 : index
    %209 = vector.load %arg20[%c0_74, %c0_75] : memref<1x32xf32, #tpu.memory_space<vmem>>, vector<1x32xf32>
    %210 = vector.broadcast %209 : vector<1x32xf32> to vector<32x32xf32>
    %211 = arith.addf %208, %210 : vector<32x32xf32>
    %212 = arith.addf %148, %211 : vector<32x32xf32>
    %c0_76 = arith.constant 0 : index
    %c0_77 = arith.constant 0 : index
    %213 = vector.load %arg21[%c0_76, %c0_77] : memref<1x32xf32, #tpu.memory_space<vmem>>, vector<1x32xf32>
    %c0_78 = arith.constant 0 : index
    %c0_79 = arith.constant 0 : index
    %214 = vector.load %arg22[%c0_78, %c0_79] : memref<1x32xf32, #tpu.memory_space<vmem>>, vector<1x32xf32>
    %cst_80 = arith.constant dense<0.000000e+00> : vector<32xf32>
    %215 = vector.multi_reduction <add>, %212, %cst_80 [1] : vector<32x32xf32> to vector<32xf32>
    %216 = vector.shape_cast %215 : vector<32xf32> to vector<32x1xf32>
    %cst_81 = arith.constant 3.200000e+01 : f32
    %217 = vector.broadcast %cst_81 : f32 to vector<32x1xf32>
    %218 = arith.divf %216, %217 : vector<32x1xf32>
    %219 = vector.broadcast %218 : vector<32x1xf32> to vector<32x32xf32>
    %220 = arith.subf %212, %219 : vector<32x32xf32>
    %221 = arith.mulf %220, %220 : vector<32x32xf32>
    %cst_82 = arith.constant dense<0.000000e+00> : vector<32xf32>
    %222 = vector.multi_reduction <add>, %221, %cst_82 [1] : vector<32x32xf32> to vector<32xf32>
    %223 = vector.shape_cast %222 : vector<32xf32> to vector<32x1xf32>
    %cst_83 = arith.constant 3.200000e+01 : f32
    %224 = vector.broadcast %cst_83 : f32 to vector<32x1xf32>
    %225 = arith.divf %223, %224 : vector<32x1xf32>
    %226 = vector.broadcast %218 : vector<32x1xf32> to vector<32x32xf32>
    %227 = arith.subf %212, %226 : vector<32x32xf32>
    %cst_84 = arith.constant 9.99999974E-6 : f32
    %228 = vector.broadcast %cst_84 : f32 to vector<32x1xf32>
    %229 = arith.addf %225, %228 : vector<32x1xf32>
    %230 = math.rsqrt %229 : vector<32x1xf32>
    %231 = vector.broadcast %230 : vector<32x1xf32> to vector<32x32xf32>
    %232 = arith.mulf %227, %231 : vector<32x32xf32>
    %233 = vector.broadcast %213 : vector<1x32xf32> to vector<32x32xf32>
    %234 = arith.mulf %232, %233 : vector<32x32xf32>
    %235 = vector.broadcast %214 : vector<1x32xf32> to vector<32x32xf32>
    %236 = arith.addf %234, %235 : vector<32x32xf32>
    %237 = arith.truncf %236 : vector<32x32xf32> to vector<32x32xbf16>
    %c0_85 = arith.constant 0 : index
    %c0_86 = arith.constant 0 : index
    %238 = vector.load %arg23[%c0_85, %c0_86] : memref<32x128xbf16, #tpu.memory_space<vmem>>, vector<32x128xbf16>
    %cst_87 = arith.constant dense<0.000000e+00> : vector<32x128xf32>
    %239 = tpu.matmul %237, %238, %cst_87 {dimension_numbers = #tpu.dot_dimension_numbers<[1], [0], [0], [1], [0, 0, 1, 1], [], []>} : vector<32x32xbf16>, vector<32x128xbf16>, vector<32x128xf32> -> vector<32x128xf32>
    %c0_88 = arith.constant 0 : index
    %c0_89 = arith.constant 0 : index
    %240 = vector.load %arg24[%c0_88, %c0_89] : memref<1x128xf32, #tpu.memory_space<vmem>>, vector<1x128xf32>
    %241 = vector.broadcast %240 : vector<1x128xf32> to vector<32x128xf32>
    %242 = arith.addf %239, %241 : vector<32x128xf32>
    %243 = arith.mulf %242, %242 : vector<32x128xf32>
    %244 = arith.mulf %242, %243 : vector<32x128xf32>
    %cst_90 = arith.constant 4.471500e-02 : f32
    %245 = vector.broadcast %cst_90 : f32 to vector<32x128xf32>
    %246 = arith.mulf %245, %244 : vector<32x128xf32>
    %247 = arith.addf %242, %246 : vector<32x128xf32>
    %cst_91 = arith.constant 0.797884583 : f32
    %248 = vector.broadcast %cst_91 : f32 to vector<32x128xf32>
    %249 = arith.mulf %248, %247 : vector<32x128xf32>
    %250 = math.tanh %249 : vector<32x128xf32>
    %cst_92 = arith.constant 1.000000e+00 : f32
    %251 = vector.broadcast %cst_92 : f32 to vector<32x128xf32>
    %252 = arith.addf %251, %250 : vector<32x128xf32>
    %cst_93 = arith.constant 5.000000e-01 : f32
    %253 = vector.broadcast %cst_93 : f32 to vector<32x128xf32>
    %254 = arith.mulf %253, %252 : vector<32x128xf32>
    %255 = arith.mulf %242, %254 : vector<32x128xf32>
    %256 = arith.truncf %255 : vector<32x128xf32> to vector<32x128xbf16>
    %c0_94 = arith.constant 0 : index
    %c0_95 = arith.constant 0 : index
    %257 = vector.load %arg25[%c0_94, %c0_95] : memref<128x32xbf16, #tpu.memory_space<vmem>>, vector<128x32xbf16>
    %cst_96 = arith.constant dense<0.000000e+00> : vector<32x32xf32>
    %258 = tpu.matmul %256, %257, %cst_96 {dimension_numbers = #tpu.dot_dimension_numbers<[1], [0], [0], [1], [0, 0, 1, 1], [], []>} : vector<32x128xbf16>, vector<128x32xbf16>, vector<32x32xf32> -> vector<32x32xf32>
    %c0_97 = arith.constant 0 : index
    %c0_98 = arith.constant 0 : index
    %259 = vector.load %arg26[%c0_97, %c0_98] : memref<1x32xf32, #tpu.memory_space<vmem>>, vector<1x32xf32>
    %260 = vector.broadcast %259 : vector<1x32xf32> to vector<32x32xf32>
    %261 = arith.addf %258, %260 : vector<32x32xf32>
    %262 = arith.addf %212, %261 : vector<32x32xf32>
    %c0_99 = arith.constant 0 : index
    %c0_100 = arith.constant 0 : index
    %263 = vector.load %arg27[%c0_99, %c0_100] : memref<1x32xf32, #tpu.memory_space<vmem>>, vector<1x32xf32>
    %c0_101 = arith.constant 0 : index
    %c0_102 = arith.constant 0 : index
    %264 = vector.load %arg28[%c0_101, %c0_102] : memref<1x32xf32, #tpu.memory_space<vmem>>, vector<1x32xf32>
    %cst_103 = arith.constant dense<0.000000e+00> : vector<32xf32>
    %265 = vector.multi_reduction <add>, %262, %cst_103 [1] : vector<32x32xf32> to vector<32xf32>
    %266 = vector.shape_cast %265 : vector<32xf32> to vector<32x1xf32>
    %cst_104 = arith.constant 3.200000e+01 : f32
    %267 = vector.broadcast %cst_104 : f32 to vector<32x1xf32>
    %268 = arith.divf %266, %267 : vector<32x1xf32>
    %269 = vector.broadcast %268 : vector<32x1xf32> to vector<32x32xf32>
    %270 = arith.subf %262, %269 : vector<32x32xf32>
    %271 = arith.mulf %270, %270 : vector<32x32xf32>
    %cst_105 = arith.constant dense<0.000000e+00> : vector<32xf32>
    %272 = vector.multi_reduction <add>, %271, %cst_105 [1] : vector<32x32xf32> to vector<32xf32>
    %273 = vector.shape_cast %272 : vector<32xf32> to vector<32x1xf32>
    %cst_106 = arith.constant 3.200000e+01 : f32
    %274 = vector.broadcast %cst_106 : f32 to vector<32x1xf32>
    %275 = arith.divf %273, %274 : vector<32x1xf32>
    %276 = vector.broadcast %268 : vector<32x1xf32> to vector<32x32xf32>
    %277 = arith.subf %262, %276 : vector<32x32xf32>
    %cst_107 = arith.constant 9.99999974E-6 : f32
    %278 = vector.broadcast %cst_107 : f32 to vector<32x1xf32>
    %279 = arith.addf %275, %278 : vector<32x1xf32>
    %280 = math.rsqrt %279 : vector<32x1xf32>
    %281 = vector.broadcast %280 : vector<32x1xf32> to vector<32x32xf32>
    %282 = arith.mulf %277, %281 : vector<32x32xf32>
    %283 = vector.broadcast %263 : vector<1x32xf32> to vector<32x32xf32>
    %284 = arith.mulf %282, %283 : vector<32x32xf32>
    %285 = vector.broadcast %264 : vector<1x32xf32> to vector<32x32xf32>
    %286 = arith.addf %284, %285 : vector<32x32xf32>
    %287 = vector.extract_strided_slice %286 {offsets = [0, 0], sizes = [16, 32], strides = [1, 1]} : vector<32x32xf32> to vector<16x32xf32>
    %cst_108 = arith.constant dense<0.000000e+00> : vector<32xf32>
    %288 = vector.multi_reduction <add>, %287, %cst_108 [0] : vector<16x32xf32> to vector<32xf32>
    %289 = vector.shape_cast %288 : vector<32xf32> to vector<1x32xf32>
    %cst_109 = arith.constant 1.600000e+01 : f32
    %290 = vector.broadcast %cst_109 : f32 to vector<1x32xf32>
    %291 = arith.divf %289, %290 : vector<1x32xf32>
    %292 = vector.extract_strided_slice %286 {offsets = [16, 0], sizes = [16, 32], strides = [1, 1]} : vector<32x32xf32> to vector<16x32xf32>
    %cst_110 = arith.constant dense<0.000000e+00> : vector<32xf32>
    %293 = vector.multi_reduction <add>, %292, %cst_110 [0] : vector<16x32xf32> to vector<32xf32>
    %294 = vector.shape_cast %293 : vector<32xf32> to vector<1x32xf32>
    %cst_111 = arith.constant 1.600000e+01 : f32
    %295 = vector.broadcast %cst_111 : f32 to vector<1x32xf32>
    %296 = arith.divf %294, %295 : vector<1x32xf32>
    %297 = tpu.concatenate %291, %296 in 0 : vector<1x32xf32>, vector<1x32xf32> -> vector<2x32xf32>
    %298 = arith.truncf %297 : vector<2x32xf32> to vector<2x32xbf16>
    %c0_112 = arith.constant 0 : index
    %c0_113 = arith.constant 0 : index
    %299 = vector.load %arg29[%c0_112, %c0_113] : memref<32x128xbf16, #tpu.memory_space<vmem>>, vector<32x128xbf16>
    %cst_114 = arith.constant dense<0.000000e+00> : vector<2x128xf32>
    %300 = tpu.matmul %298, %299, %cst_114 {dimension_numbers = #tpu.dot_dimension_numbers<[1], [0], [0], [1], [0, 0, 1, 1], [], []>} : vector<2x32xbf16>, vector<32x128xbf16>, vector<2x128xf32> -> vector<2x128xf32>
    %c0_115 = arith.constant 0 : index
    %c0_116 = arith.constant 0 : index
    %301 = vector.load %arg30[%c0_115, %c0_116] : memref<1x128xf32, #tpu.memory_space<vmem>>, vector<1x128xf32>
    %302 = vector.broadcast %301 : vector<1x128xf32> to vector<2x128xf32>
    %303 = arith.addf %300, %302 : vector<2x128xf32>
    %c0_117 = arith.constant 0 : index
    %c0_118 = arith.constant 0 : index
    %304 = vector.load %arg31[%c0_117, %c0_118] : memref<2x128xf32, #tpu.memory_space<vmem>>, vector<2x128xf32>
    tpu.vector_store %arg31[%c0_117, %c0_118], %303 {strides = array<i32>} : memref<2x128xf32, #tpu.memory_space<vmem>>, vector<2x128xf32>,
    return
  }
}

</mosaic_0001>

<bundles_post_ra>
// kernel: wsl_dr_forward.1
= control target key start
LH: loop header
LB: loop body
LE: loop exit
PB: predicated region body
PF: predicated region fallthrough
CT: control target
= control target key end

     0   :  { %s2057_s6 = smov 1   ;;  %s2058_s10 = smov 2   ;;  %s2881_s0 = inlined_call_operand.smem [shape: u32[32], index: -1, kind: input, shape index: {}] }
   0x1   :  { %s2107_s5 = sld [smem:[%s2881_s0]]   ;;  %s2059_s14 = smov 3  }
   0x2   :  { %s2112_s9 = sld [smem:[%s2881_s0 + %s2057_s6]]   ;;  %s2060_s18 = smov 4  }
   0x3   :  { %s1742_s13 = sld [smem:[%s2881_s0 + %s2058_s10]]   ;;  %s2061_s22 = smov 5  }
   0x4   :  { %s2120_s17 = sld [smem:[%s2881_s0 + %s2059_s14]]   ;;  %s2062_s26 = smov 6  }
   0x5   :  { %s2125_s21 = sld [smem:[%s2881_s0 + %s2060_s18]]   ;;  %s2063_s30 = smov 7  }
   0x6   :  { %s2130_s25 = sld [smem:[%s2881_s0 + %s2061_s22]]   ;;  %s2064_s4 = smov 8  }
   0x7   :  { %s2135_s29 = sld [smem:[%s2881_s0 + %s2062_s26]]   ;;  %s2065_s10 = smov 9  }
   0x8   :  { %s2140_s3 = sld [smem:[%s2881_s0 + %s2063_s30]]   ;;  %s2066_s15 = smov 10  }
   0x9   :  { %s2145_s8 = sld [smem:[%s2881_s0 + %s2064_s4]]   ;;  %v68_v0 = vstv %s1742_s13  ;;  %s2067_s20 = smov 11  }
   0xa   :  { %s2150_s14 = sld [smem:[%s2881_s0 + %s2065_s10]]   ;;  %69 = vst [vmem:[#allocation2] sm:$0x1] %v68_v0  ;;  %s2068_s13 = smov 12  }
   0xb   :  { %s2155_s19 = sld [smem:[%s2881_s0 + %s2066_s15]]   ;;  %s2069_s30 = smov 13  }
   0xc   :  { %s2160_s24 = sld [smem:[%s2881_s0 + %s2067_s20]]   ;;  %s2070_s6 = smov 14  }
   0xd   :  { %s2165_s28 = sld [smem:[%s2881_s0 + %s2068_s13]]   ;;  %s2071_s12 = smov 15  }
   0xe   :  { %s2170_s4 = sld [smem:[%s2881_s0 + %s2069_s30]]   ;;  %s2072_s20 = smov 16  }
   0xf   :  { %s2175_s11 = sld [smem:[%s2881_s0 + %s2070_s6]]   ;;  %s2073_s26 = smov 17  }
  0x10   :  { %s2180_s18 = sld [smem:[%s2881_s0 + %s2071_s12]]   ;;  %s2074_s2 = smov 18  }
  0x11   :  { %s2185_s13 = sld [smem:[%s2881_s0 + %s2072_s20]]   ;;  %s2075_s12 = smov 19  }
  0x12   :  { %s2190_s1 = sld [smem:[%s2881_s0 + %s2073_s26]]   ;;  %s2076_s20 = smov 20  }
  0x13   :  { %s2195_s10 = sld [smem:[%s2881_s0 + %s2074_s2]]   ;;  %s2077_s26 = smov 21  }
  0x14   :  { %2886 = sst [smem:[#allocation6_spill]] %s2170_s4  ;;  %s2078_s2 = smov 22  }
  0x15   :  { %2887 = sst [smem:[#allocation7_spill]] %s2175_s11 }
  0x16   :  { %s2200_s11 = sld [smem:[%s2881_s0 + %s2075_s12]]   ;;  %s2079_s12 = smov 23  }
  0x17   :  { %2888 = sst [smem:[#allocation8_spill]] %s2185_s13 }
  0x18   :  { %s2205_s13 = sld [smem:[%s2881_s0 + %s2076_s20]]   ;;  %s2080_s20 = smov 24  }
  0x19   :  { %2889 = sst [smem:[#allocation9_spill]] %s2195_s10 }
  0x1a   :  { %s2210_s4 = sld [smem:[%s2881_s0 + %s2077_s26]]   ;;  %s2081_s26 = smov 25  }
  0x1b   :  { %s2215_s10 = sld [smem:[%s2881_s0 + %s2078_s2]]   ;;  %s2082_s2 = smov 26  }
  0x1c   :  { %2890 = sst [smem:[#allocation10_spill]] %s2200_s11 }
  0x1d   :  { %s2220_s11 = sld [smem:[%s2881_s0 + %s2079_s12]]   ;;  %s2083_s12 = smov 27  }
  0x1e   :  { %2891 = sst [smem:[#allocation11_spill]] %s2205_s13 }
  0x1f   :  { %s2225_s13 = sld [smem:[%s2881_s0 + %s2080_s20]]   ;;  %s2084_s20 = smov 28  }
  0x20   :  { %2892 = sst [smem:[#allocation12_spill]] %s2210_s4 }
  0x21   :  { %2893 = sst [smem:[#allocation13_spill]] %s2215_s10 }
  0x22   :  { %s2230_s4 = sld [smem:[%s2881_s0 + %s2081_s26]]   ;;  %s2085_s26 = smov 29  }
  0x23   :  { %2894 = sst [smem:[#allocation14_spill]] %s2220_s11 }
  0x24   :  { %s2235_s10 = sld [smem:[%s2881_s0 + %s2082_s2]]   ;;  %s2086_s2 = smov 30  }
  0x25   :  { %2895 = sst [smem:[#allocation15_spill]] %s2225_s13 }
  0x26   :  { %s2240_s11 = sld [smem:[%s2881_s0 + %s2083_s12]]   ;;  %s2087_s12 = smov 31  }
  0x27   :  { %s2245_s13 = sld [smem:[%s2881_s0 + %s2084_s20]]  }
  0x28   :  { %2896 = sst [smem:[#allocation16_spill]] %s2230_s4 }
  0x29   :  { %s2250_s4 = sld [smem:[%s2881_s0 + %s2085_s26]]  }
  0x2a   :  { %2897 = sst [smem:[#allocation17_spill]] %s2235_s10 }
  0x2b   :  { %s2255_s10 = sld [smem:[%s2881_s0 + %s2086_s2]]  }
  0x2c   :  { %2898 = sst [smem:[#allocation18_spill]] %s2240_s11 }
  0x2d   :  { %s2260_s11 = sld [smem:[%s2881_s0 + %s2087_s12]]  }
  0x2e   :  { %v1932_v1 = vld [vmem:[%s2112_s9] ss:$0 sm:$0xff]  ;;  %v2088_v2 = vmov 1   ;;  %v1866_v3 = vld [vmem:[%s2120_s17 + $0x10] sm:$0xff]  ;;  %v2089_v4 = vmov 0   ;;  %v1865_v5 = vld [vmem:[%s2120_s17 + $0x8] sm:$0xff] }
  0x2f   :  { %1925 = vset.pattern.permute.xlu0 %v2088_v2  ;;  %1927 = vset.pattern.permute.xlu1 %v2089_v4  ;;  %v1864_v6 = vld [vmem:[%s2120_s17] sm:$0xff]  ;;  %v2270_v8 = vld [vmem:[%s2107_s5 + $0x8] sm:$0xff] }
  0x30   :  { %150 = vperm.xlu0 %1925, %v1932_v1   ;;  %487 = vmatpush.bf16.msra.mxu0 %v1866_v3  ;;  %v2267_v7 = vld [vmem:[%s2107_s5] sm:$0xff] }
  0x31   :  { %142 = vperm.xlu1 %1927, %v1932_v1   ;;  %1929 = vset.pattern.permute.xlu2 %v2089_v4 }
  0x34   :  { %488 = vmatpush.bf16.msra.mxu0 %v1865_v5 }
  0x35   :  { %70 = vsyncpa [#allocation4], 0  ;;  %v2090_v9 = vmov 2   ;;  %v445_v10 = vpack.c.bf16 %v2270_v8, %v2267_v7  ;;  %vm475_vm0 = vcmask 392192   ;;  %v2275_v11 = vld [vmem:[%s2107_s5 + $0x10] sm:$0xff]  ;;  %v2278_v12 = vld [vmem:[%s2107_s5 + $0x18] sm:$0xff] }
  0x36   :  { %v446_v13 = vpack.c.bf16 %v2278_v12, %v2275_v11  ;;  %v1933_v14 = vld [vmem:[#allocation2] ss:$0 sm:$0xff]  ;;  %s2091_s0 = smov 112   ;;  %s2092_s5 = smov 96   ;;  %vm503_vm1 = vcmask 261120  }
  0x37   :  { %v1934_v27 = vld [vmem:[%s2125_s21] ss:$0 sm:$0xff]  ;;  %s2094_s9 = smov 32   ;;  %s2095_s17 = smov 16  }
  0x38   :  { %1926 = vset.pattern.permute.xlu0 %v2090_v9  ;;  %489 = vmatpush.bf16.msra.mxu0 %v1864_v6  ;;  %s2899_s21 = sld [smem:[#allocation6_spill]]  ;;  %s1732_s26 = sshll.u32 %s2260_s11, 4  ;;  %s1733_s26 = int_to_ptr.hbm [resolvable:$true] %s1732_s26 }
  0x39   :  { %178 = vperm.xlu0 %1926, %v1932_v1   ;;  %1930 = vset.pattern.permute.xlu1 %v2088_v2  ;;  %s2909_s20 = sld [smem:[#allocation15_spill]]  ;;  %s2043_s27 = sshra.s32 %s1733_s26, 4  ;;  %s2044_s27 = int_to_ptr.hbm [resolvable:$true] %s2043_s27 }
  0x3a   :  { %s2910_s22 = sld [smem:[#allocation17_spill]]  ;;  %s2045_s30 = scalar_lea.hbm %s2044_s27, 2 }
  0x3b   :  { %1788 = vmatmul.msk.bf16.vlgmr.msra.gmra.mxu0 %vm475_vm0, %v445_v10  ;;  %s2911_s23 = sld [smem:[#allocation18_spill]]  ;;  %p2046_p0 = scmp.ne.s32.totalorder %s2044_s27, %s2045_s30 }
  0x3c   :  { %s2047_s2 = scalar_lea.hbm %s2260_s11, 2  ;;  %p2048_p1 = scmp.lt.s32.totalorder %s2044_s27, %s2260_s11 }
  0x3d   :  { %p2049_p2 = scmp.lt.s32.totalorder %s2047_s2, %s2045_s30 }
  0x3f   :  { %p2050_p3 = por %p2049_p2, %p2048_p1 }
  0x41   :  { %1928 = vset.pattern.permute.xlu0 %v2089_v4  ;;  %p2051_p4 = pnand %p2050_p3, %p2046_p0 }
  0x42   :  { %209 = vperm.xlu0 %1928, %v1933_v14  }
  0x4a   :  { %1931 = vset.pattern.permute.xlu0 %v2088_v2 }
  0x4b   :  { %1789 = vmatmul.msk.bf16.gmra.mxu0 %vm475_vm0, %v446_v13 }
  0xa2   :  { %v151_v15 = vpop.permute.xlu0 %150 }
  0xa3   :  { %v154_v16 = vmul.f32 %v151_v15, %v2270_v8  ;;  %v153_v17 = vmul.f32 %v151_v15, %v2267_v7  ;;  %v155_v19 = vmul.f32 %v151_v15, %v2275_v11  ;;  %v156_v20 = vmul.f32 %v151_v15, %v2278_v12  ;;  %v143_v40 = vpop.permute.xlu1 %142 }
  0xa4   :  { %v145_v41 = vmul.f32 %v143_v40, %v2267_v7  ;;  %v146_v47 = vmul.f32 %v143_v40, %v2270_v8  ;;  %v148_v50 = vmul.f32 %v143_v40, %v2278_v12  ;;  %v147_v57 = vmul.f32 %v143_v40, %v2275_v11 }
  0xa5   :  { %163 = vrot.lane.b32.xlu2 %v154_v16, %s2091_s0  ;;  %161 = vrot.lane.b32.xlu1 %v153_v17, %s2091_s0 }
  0xab   :  { %v179_v18 = vpop.permute.xlu0 %178 }
  0xac   :  { %v182_v21 = vmul.f32 %v179_v18, %v2270_v8  ;;  %v181_v22 = vmul.f32 %v179_v18, %v2267_v7  ;;  %v183_v23 = vmul.f32 %v179_v18, %v2275_v11  ;;  %v184_v25 = vmul.f32 %v179_v18, %v2278_v12 }
  0xad   :  { %165 = vrot.lane.b32.xlu2 %v155_v19, %s2091_s0  ;;  %167 = vrot.lane.b32.xlu1 %v156_v20, %s2091_s0 }
  0xae   :  { %191 = vrot.lane.b32.xlu0 %v182_v21, %s2092_s5 }
  0xb4   :  { %v210_v42 = vpop.permute.xlu0 %209 }
  0xb5   :  { %189 = vrot.lane.b32.xlu2 %v181_v22, %s2092_s5  ;;  %193 = vrot.lane.b32.xlu1 %v183_v23, %s2092_s5 }
  0xb8   :  { %v491_v24 = vpop.f32.mrf.mxu0 }
  0xb9   :  { %v2303_v31 = vadd.f32 %v1934_v27, %v491_v24 }
  0xbb   :  { %v504_v32 = vsel %vm503_vm1, %v2303_v31, 0.0 }
  0xbd   :  { %195 = vrot.lane.b32.xlu2 %v184_v25, %s2092_s5 }
  0xc0   :  { %v493_v26 = vpop.f32.mrf.mxu0 }
  0xc1   :  { %v2307_v33 = vadd.f32 %v1934_v27, %v493_v26 }
  0xc3   :  { %v507_v35 = vsel %vm503_vm1, %v2307_v33, 0.0 }
  0xc8   :  { %v496_v28 = vpop.f32.mrf.mxu0 }
  0xc9   :  { %v2299_v29 = vadd.f32 %v1934_v27, %v496_v28 }
  0xcb   :  { %v510_v30 = vsel %vm503_vm1, %v2299_v29, 0.0 }
  0xd0   :  { %v498_v34 = vpop.f32.mrf.mxu0 }
  0xd1   :  { %v2311_v36 = vadd.f32 %v1934_v27, %v498_v34 }
  0xd3   :  { %v513_v37 = vsel %vm503_vm1, %v2311_v36, 0.0 }
  0xd8   :  { %511 = vadd.xlane.f32.xlu0 %v510_v30  ;;  %v2093_v30 = vmov 32.0  }
  0xdf   :  { %505 = vadd.xlane.f32.xlu1 %v504_v32 }
  0xe6   :  { %508 = vadd.xlane.f32.xlu2 %v507_v35 }
  0xee   :  { %514 = vadd.xlane.f32.xlu2 %v513_v37 }
  0xff   :  { %v164_v38 = vpop.permute.xlu2 %163 }
 0x100   :  { %v174_v51 = vadd.f32 %v164_v38, %v146_v47 }
 0x107   :  { %v166_v39 = vpop.permute.xlu2 %165 }
 0x108   :  { %v175_v63 = vadd.f32 %v166_v39, %v147_v57 }
 0x10f   :  { %v190_v43 = vpop.permute.xlu2 %189 }
 0x117   :  { %v162_v44 = vpop.permute.xlu1 %161  ;;  %v196_v55 = vpop.permute.xlu2 %195 }
 0x118   :  { %v173_v45 = vadd.f32 %v162_v44, %v145_v41 }
 0x11a   :  { %v201_v46 = vadd.f32 %v190_v43, %v173_v45 }
 0x11c   :  { %v212_v48 = vadd.f32 %v210_v42, %v201_v46 }
 0x11e   :  { %v1772_v49 = vmul.f32 -1.442695, %v212_v48 }
 0x11f   :  { %v168_v52 = vpop.permute.xlu1 %167 }
 0x120   :  { %1951 = vpow2.f32 %v1772_v49  ;;  %v176_v53 = vadd.f32 %v168_v52, %v148_v50  ;;  %v192_v54 = vpop.permute.xlu0 %191 }
 0x121   :  { %v202_v56 = vadd.f32 %v192_v54, %v174_v51 }
 0x122   :  { %v204_v58 = vadd.f32 %v196_v55, %v176_v53 }
 0x123   :  { %v213_v59 = vadd.f32 %v210_v42, %v202_v56 }
 0x124   :  { %v215_v60 = vadd.f32 %v210_v42, %v204_v58 }
 0x125   :  { %v1773_v61 = vmul.f32 -1.442695, %v213_v59 }
 0x126   :  { %v1952_v62 = vpop.eup %1951  ;;  %v1775_v0 = vmul.f32 -1.442695, %v215_v60 }
 0x127   :  { %v228_v1 = vadd.f32 1.0, %v1952_v62  ;;  %1953 = vpow2.f32 %v1773_v61  ;;  %v194_v2 = vpop.permute.xlu1 %193 }
 0x128   :  { %1955 = vpow2.f32 %v1775_v0  ;;  %v203_v3 = vadd.f32 %v194_v2, %v175_v63 }
 0x129   :  { %1957 = vrcp.f32 %v228_v1  ;;  %v243_v17 = vand.u32 2147483648, %v228_v1  ;;  %v241_v20 = vand.u32 2147483647, %v228_v1  ;;  %vm237_vm3 = vweird.f32 %v228_v1 }
 0x12a   :  { %v214_v4 = vadd.f32 %v210_v42, %v203_v3 }
 0x12b   :  { %v244_v24 = vor.u32 1.1754944e-38, %v243_v17  ;;  %vm242_vm5 = vcmp.eq.f32.partialorder %v241_v20, 8.507059e+37 }
 0x12c   :  { %v1774_v5 = vmul.f32 -1.442695, %v214_v4 }
 0x12d   :  { %v1954_v6 = vpop.eup %1953 }
 0x12e   :  { %v1956_v9 = vpop.eup %1955  ;;  %1959 = vpow2.f32 %v1774_v5  ;;  %v2319_v14 = vadd.f32 1.0, %v1954_v6 }
 0x12f   :  { %v1958_v10 = vpop.eup %1957  ;;  %v231_v13 = vadd.f32 1.0, %v1956_v9 }
 0x130   :  { %v233_v15 = vmul.f32 %v1958_v10, %v228_v1  ;;  %vm238_vm2 = vweird.f32 %v1958_v10  ;;  %v258_v59 = vand.u32 2147483648, %v2319_v14  ;;  %vm252_vm15 = vweird.f32 %v2319_v14 }
 0x131   :  { %1961 = vrcp.f32 %v231_v13  ;;  %vm239_vm4 = vmor %vm237_vm3, %vm238_vm2  ;;  %v288_v34 = vand.u32 2147483648, %v231_v13  ;;  %v286_v37 = vand.u32 2147483647, %v231_v13  ;;  %vm282_vm7 = vweird.f32 %v231_v13 }
 0x132   :  { %v234_v16 = vsub.f32 1.0, %v233_v15  ;;  %1963 = vrcp.f32 %v2319_v14  ;;  %v256_v61 = vand.u32 2147483647, %v2319_v14  ;;  %v259_v63 = vor.u32 1.1754944e-38, %v258_v59 }
 0x133   :  { %v289_v43 = vor.u32 1.1754944e-38, %v288_v34  ;;  %vm287_vm9 = vcmp.eq.f32.partialorder %v286_v37, 8.507059e+37 }
 0x134   :  { %v1960_v18 = vpop.eup %1959  ;;  %v235_v19 = vmul.f32 %v1958_v10, %v234_v16  ;;  %vm257_vm2 = vcmp.eq.f32.partialorder %v256_v61, 8.507059e+37 }
 0x135   :  { %v230_v21 = vadd.f32 1.0, %v1960_v18 }
 0x136   :  { %v236_v22 = vadd.f32 %v1958_v10, %v235_v19 }
 0x137   :  { %v1962_v23 = vpop.eup %1961  ;;  %1965 = vrcp.f32 %v230_v21  ;;  %v273_v48 = vand.u32 2147483648, %v230_v21  ;;  %v271_v50 = vand.u32 2147483647, %v230_v21  ;;  %vm267_vm11 = vweird.f32 %v230_v21 }
 0x138   :  { %v240_v25 = vsel %vm239_vm4, %v1958_v10, %v236_v22  ;;  %v278_v26 = vmul.f32 %v1962_v23, %v231_v13  ;;  %v1964_v27 = vpop.eup %1963  ;;  %1967 = vrcp.f32 %v2093_v30  ;;  %vm283_vm6 = vweird.f32 %v1962_v23 }
 0x139   :  { %v2322_v28 = vsel %vm242_vm5, %v244_v24, %v240_v25  ;;  %v248_v38 = vmul.f32 %v1964_v27, %v2319_v14  ;;  %vm284_vm8 = vmor %vm282_vm7, %vm283_vm6  ;;  %v274_v54 = vor.u32 1.1754944e-38, %v273_v48  ;;  %vm272_vm13 = vcmp.eq.f32.partialorder %v271_v50, 8.507059e+37 }
 0x13a   :  { %365 = vrot.lane.b32.xlu0 %v2322_v28, %s2094_s9  ;;  %317 = vrot.lane.b32.xlu1 %v2322_v28, %s2095_s17  ;;  %v279_v32 = vsub.f32 1.0, %v278_v26  ;;  %vm253_vm14 = vweird.f32 %v1964_v27  ;;  %v292_v18 = vmul.f32 %v2322_v28, %v2267_v7  ;;  %vm296_vm4 = vcmask 130048  }
 0x13b   :  { %v249_v46 = vsub.f32 1.0, %v248_v38  ;;  %vm254_vm0 = vmor %vm252_vm15, %vm253_vm14 }
 0x13c   :  { %v280_v35 = vmul.f32 %v1962_v23, %v279_v32 }
 0x13d   :  { %v1966_v39 = vpop.eup %1965  ;;  %v250_v53 = vmul.f32 %v1964_v27, %v249_v46 }
 0x13e   :  { %v281_v40 = vadd.f32 %v1962_v23, %v280_v35  ;;  %v263_v41 = vmul.f32 %v1966_v39, %v230_v21  ;;  %v1968_v42 = vpop.eup %1967  ;;  %vm268_vm10 = vweird.f32 %v1966_v39 }
 0x13f   :  { %v517_v51 = vmul.f32 32.0, %v1968_v42  ;;  %vm269_vm12 = vmor %vm267_vm11, %vm268_vm10  ;;  %v251_v58 = vadd.f32 %v1964_v27, %v250_v53  ;;  %vm521_vm3 = vweird.f32 %v1968_v42 }
 0x140   :  { %v285_v44 = vsel %vm284_vm8, %v1962_v23, %v281_v40  ;;  %v264_v45 = vsub.f32 1.0, %v263_v41 }
 0x141   :  { %v2329_v47 = vsel %vm287_vm9, %v289_v43, %v285_v44  ;;  %v518_v56 = vsub.f32 1.0, %v517_v51  ;;  %v255_v62 = vsel %vm254_vm0, %v1964_v27, %v251_v58 }
 0x142   :  { %371 = vrot.lane.b32.xlu0 %v2329_v47, %s2094_s9  ;;  %v265_v49 = vmul.f32 %v1966_v39, %v264_v45  ;;  %v260_v1 = vsel %vm257_vm2, %v259_v63, %v255_v62  ;;  %v295_v50 = vmul.f32 %v2329_v47, %v2278_v12 }
 0x143   :  { %v519_v60 = vmul.f32 %v1968_v42, %v518_v56  ;;  %v293_v45 = vmul.f32 %v260_v1, %v2270_v8 }
 0x144   :  { %v266_v52 = vadd.f32 %v1966_v39, %v265_v49 }
 0x145   :  { %v520_v0 = vadd.f32 %v1968_v42, %v519_v60  ;;  %v300_v46 = vsel %vm296_vm4, %v293_v45, 0.0 }
 0x146   :  { %v270_v55 = vsel %vm269_vm12, %v1966_v39, %v266_v52  ;;  %v306_v52 = vsel %vm296_vm4, %v295_v50, 0.0 }
 0x147   :  { %v2333_v57 = vsel %vm272_vm13, %v274_v54, %v270_v55  ;;  %v2341_v2 = vsel %vm521_vm3, %v1968_v42, %v520_v0  ;;  %vm644_vm3 = vcmask 1040384  }
 0x148   :  { %321 = vrot.lane.b32.xlu1 %v2333_v57, %s2095_s17  ;;  %v294_v48 = vmul.f32 %v2333_v57, %v2275_v11 }
 0x14a   :  { %v303_v49 = vsel %vm296_vm4, %v294_v48, 0.0 }
 0x14b   :  { %v512_v10 = vpop.xlane.xlu0 %511 }
 0x14c   :  { %v525_v13 = vmul.f32 %v2341_v2, %v512_v10 }
 0x14e   :  { %v2352_v14 = vsub.f32 %v2299_v29, %v525_v13  ;;  %v297_v29 = vsel %vm296_vm4, %v292_v18, 0.0 }
 0x150   :  { %367 = vrot.lane.b32.xlu1 %v260_v1, %s2094_s9  ;;  %v533_v15 = vmul.f32 %v2352_v14, %v2352_v14 }
 0x152   :  { %v506_v3 = vpop.xlane.xlu1 %505  ;;  %v541_v16 = vsel %vm503_vm1, %v533_v15, 0.0 }
 0x153   :  { %v523_v4 = vmul.f32 %v2341_v2, %v506_v3 }
 0x155   :  { %v2345_v5 = vsub.f32 %v2303_v31, %v523_v4 }
 0x157   :  { %v531_v6 = vmul.f32 %v2345_v5, %v2345_v5 }
 0x159   :  { %v535_v9 = vsel %vm503_vm1, %v531_v6, 0.0  ;;  %v509_v31 = vpop.xlane.xlu2 %508 }
 0x15a   :  { %536 = vadd.xlane.f32.xlu2 %v535_v9  ;;  %v524_v17 = vmul.f32 %v2341_v2, %v509_v31 }
 0x15c   :  { %v2362_v19 = vsub.f32 %v2307_v33, %v524_v17 }
 0x15e   :  { %v532_v20 = vmul.f32 %v2362_v19, %v2362_v19 }
 0x160   :  { %v538_v21 = vsel %vm503_vm1, %v532_v20, 0.0 }
 0x161   :  { %v515_v22 = vpop.xlane.xlu2 %514 }
 0x162   :  { %v526_v23 = vmul.f32 %v2341_v2, %v515_v22 }
 0x164   :  { %v2374_v33 = vsub.f32 %v2311_v36, %v526_v23 }
 0x166   :  { %v534_v24 = vmul.f32 %v2374_v33, %v2374_v33 }
 0x168   :  { %v544_v25 = vsel %vm503_vm1, %v534_v24, 0.0 }
 0x16c   :  { %542 = vadd.xlane.f32.xlu0 %v541_v16 }
 0x172   :  { %319 = vrot.lane.b32.xlu2 %v260_v1, %s2095_s17 }
 0x17a   :  { %323 = vrot.lane.b32.xlu2 %v2329_v47, %s2095_s17  ;;  %298 = vadd.xlane.f32.xlu1 %v297_v29 }
 0x182   :  { %369 = vrot.lane.b32.xlu2 %v2333_v57, %s2094_s9  ;;  %539 = vadd.xlane.f32.xlu1 %v538_v21 }
 0x1ab   :  { %545 = vadd.xlane.f32.xlu2 %v544_v25 }
 0x1ac   :  { %v318_v26 = vpop.permute.xlu1 %317  ;;  %v366_v32 = vpop.permute.xlu0 %365 }
 0x1ad   :  { %v329_v27 = vmul.f32 %v318_v26, %v2267_v7  ;;  %v377_v36 = vmul.f32 %v366_v32, %v2267_v7  ;;  %v413_v32 = vld [vmem:[%s2140_s3] sm:$0x7]  ;;  %s2097_s3 = smov 64  }
 0x1ae   :  { %v2437_v45 = vperm.slane %v413_v32, 2 }
 0x1af   :  { %337 = vrot.lane.b32.xlu1 %v329_v27, %s2091_s0 }
 0x1b4   :  { %v372_v34 = vpop.permute.xlu0 %371 }
 0x1b5   :  { %v380_v35 = vmul.f32 %v372_v34, %v2278_v12 }
 0x1ba   :  { %v322_v28 = vpop.permute.xlu1 %321 }
 0x1bb   :  { %v331_v30 = vmul.f32 %v322_v28, %v2275_v11 }
 0x1bd   :  { %341 = vrot.lane.b32.xlu0 %v331_v30, %s2091_s0 }
 0x1c2   :  { %v368_v40 = vpop.permute.xlu1 %367 }
 0x1c3   :  { %v378_v42 = vmul.f32 %v368_v40, %v2270_v8  ;;  %v2428_v40 = vperm.slane %v413_v32, 0 }
 0x1c5   :  { %385 = vrot.lane.b32.xlu0 %v377_v36, %s2092_s5 }
 0x1cd   :  { %v537_v37 = vpop.xlane.xlu2 %536  ;;  %391 = vrot.lane.b32.xlu0 %v380_v35, %s2092_s5  ;;  %v2424_v35 = vperm.slane %v413_v32, 1 }
 0x1ce   :  { %v547_v6 = vmul.f32 %v537_v37, %v2341_v2 }
 0x1d0   :  { %v551_v9 = vadd.f32 1e-05, %v547_v6 }
 0x1d2   :  { %1969 = vrsqrt.f32 %v551_v9  ;;  %vm561_vm6 = vweird.f32 %v551_v9 }
 0x1d5   :  { %v320_v38 = vpop.permute.xlu2 %319 }
 0x1d6   :  { %v330_v39 = vmul.f32 %v320_v38, %v2270_v8 }
 0x1d8   :  { %339 = vrot.lane.b32.xlu2 %v330_v39, %s2091_s0  ;;  %v1970_v10 = vpop.eup %1969 }
 0x1d9   :  { %v556_v15 = vmul.f32 %v1970_v10, %v551_v9  ;;  %vm562_vm5 = vweird.f32 %v1970_v10 }
 0x1da   :  { %vm563_vm7 = vmor %vm561_vm6, %vm562_vm5 }
 0x1db   :  { %v557_v31 = vmul.f32 %v1970_v10, %v556_v15 }
 0x1dd   :  { %v324_v41 = vpop.permute.xlu2 %323  ;;  %v558_v17 = vmul.f32 0.5, %v557_v31 }
 0x1de   :  { %v332_v43 = vmul.f32 %v324_v41, %v2278_v12 }
 0x1df   :  { %v543_v55 = vpop.xlane.xlu0 %542  ;;  %v559_v21 = vsub.f32 1.5, %v558_v17 }
 0x1e0   :  { %387 = vrot.lane.b32.xlu2 %v378_v42, %s2092_s5  ;;  %343 = vrot.lane.b32.xlu1 %v332_v43, %s2091_s0  ;;  %v549_v25 = vmul.f32 %v543_v55, %v2341_v2  ;;  %v2432_v43 = vld [vmem:[%s2130_s25] ss:$0 sm:$0xff]  ;;  %s2900_s25 = sld [smem:[#allocation7_spill]] }
 0x1e1   :  { %v560_v26 = vmul.f32 %v1970_v10, %v559_v21 }
 0x1e2   :  { %v2422_v34 = vadd.f32 1e-05, %v549_v25 }
 0x1e3   :  { %v564_v38 = vsel %vm563_vm7, %v1970_v10, %v560_v26 }
 0x1e4   :  { %vm581_vm15 = vweird.f32 %v2422_v34 }
 0x1e5   :  { %v370_v7 = vpop.permute.xlu2 %369 }
 0x1e6   :  { %v379_v44 = vmul.f32 %v370_v7, %v2275_v11  ;;  %v595_v7 = vmul.f32 %v564_v38, %v2345_v5 }
 0x1e8   :  { %389 = vrot.lane.b32.xlu1 %v379_v44, %s2092_s5 }
 0x1ed   :  { %v299_v51 = vpop.xlane.xlu1 %298 }
 0x1ee   :  { %v309_v41 = vmul.f32 0.0625, %v299_v51 }
 0x1f0   :  { %v415_v48 = vmul.f32 %v2428_v40, %v309_v41 }
 0x1f5   :  { %v540_v53 = vpop.xlane.xlu1 %539 }
 0x1f6   :  { %v548_v13 = vmul.f32 %v540_v53, %v2341_v2 }
 0x1f7   :  { %301 = vadd.xlane.f32.xlu0 %v300_v46 }
 0x1f8   :  { %v552_v16 = vadd.f32 1e-05, %v548_v13 }
 0x1fa   :  { %1971 = vrsqrt.f32 %v552_v16  ;;  %vm571_vm9 = vweird.f32 %v552_v16 }
 0x200   :  { %v1972_v20 = vpop.eup %1971 }
 0x201   :  { %v566_v24 = vmul.f32 %v1972_v20, %v552_v16  ;;  %vm572_vm8 = vweird.f32 %v1972_v20 }
 0x202   :  { %vm573_vm10 = vmor %vm571_vm9, %vm572_vm8 }
 0x203   :  { %v567_v36 = vmul.f32 %v1972_v20, %v566_v24 }
 0x205   :  { %v568_v42 = vmul.f32 0.5, %v567_v36 }
 0x207   :  { %v569_v50 = vsub.f32 1.5, %v568_v42 }
 0x209   :  { %304 = vadd.xlane.f32.xlu2 %v303_v49 }
 0x212   :  { %307 = vadd.xlane.f32.xlu1 %v306_v52  ;;  %v602_v52 = vmul.f32 %v2432_v43, %v595_v7 }
 0x21e   :  { %v546_v56 = vpop.xlane.xlu2 %545 }
 0x21f   :  { %v550_v23 = vmul.f32 %v546_v56, %v2341_v2 }
 0x221   :  { %v338_v54 = vpop.permute.xlu1 %337  ;;  %v2419_v30 = vadd.f32 1e-05, %v550_v23 }
 0x222   :  { %v349_v8 = vsel %vm296_vm4, %v338_v54, 0.0  ;;  %v2442_v54 = vld [vmem:[%s2145_s8] ss:$0 sm:$0xff]  ;;  %s2902_s8 = sld [smem:[#allocation9_spill]] }
 0x223   :  { %350 = vadd.xlane.f32.xlu0 %v349_v8  ;;  %1973 = vrsqrt.f32 %v2419_v30  ;;  %v2445_v8 = vld [vmem:[%s2135_s29] ss:$0 sm:$0xff]  ;;  %vm591_vm13 = vweird.f32 %v2419_v30  ;;  %s2901_s29 = sld [smem:[#allocation8_spill]] }
 0x224   :  { %1975 = vrsqrt.f32 %v2422_v34 }
 0x229   :  { %v1974_v51 = vpop.eup %1973 }
 0x22a   :  { %v1976_v56 = vpop.eup %1975  ;;  %vm592_vm11 = vweird.f32 %v1974_v51 }
 0x22b   :  { %vm582_vm12 = vweird.f32 %v1976_v56  ;;  %vm593_vm14 = vmor %vm591_vm13, %vm592_vm11 }
 0x22c   :  { %vm583_vm0 = vmor %vm581_vm15, %vm582_vm12 }
 0x22f   :  { %v342_v58 = vpop.permute.xlu0 %341 }
 0x230   :  { %v355_v11 = vsel %vm296_vm4, %v342_v58, 0.0 }
 0x231   :  { %356 = vadd.xlane.f32.xlu1 %v355_v11 }
 0x232   :  { %v340_v57 = vpop.permute.xlu2 %339 }
 0x233   :  { %v352_v59 = vsel %vm296_vm4, %v340_v57, 0.0  ;;  %v570_v57 = vmul.f32 %v1972_v20, %v569_v50  ;;  %v2096_v50 = vmov 16.0  }
 0x234   :  { %353 = vadd.xlane.f32.xlu2 %v352_v59  ;;  %v586_v59 = vmul.f32 %v1974_v51, %v2419_v30  ;;  %1977 = vrcp.f32 %v2096_v50 }
 0x237   :  { %v386_v12 = vpop.permute.xlu0 %385 }
 0x238   :  { %v397_v60 = vsel %vm296_vm4, %v386_v12, 0.0 }
 0x23a   :  { %v388_v47 = vpop.permute.xlu2 %387 }
 0x23b   :  { %v400_v61 = vsel %vm296_vm4, %v388_v47, 0.0  ;;  %v609_v47 = vadd.f32 %v2445_v8, %v602_v52 }
 0x23c   :  { %398 = vadd.xlane.f32.xlu2 %v397_v60  ;;  %401 = vadd.xlane.f32.xlu1 %v400_v61 }
 0x23f   :  { %v392_v62 = vpop.permute.xlu0 %391 }
 0x240   :  { %v406_v63 = vsel %vm296_vm4, %v392_v62, 0.0  ;;  %v576_v62 = vmul.f32 %v1976_v56, %v2422_v34 }
 0x242   :  { %v577_v9 = vmul.f32 %v1976_v56, %v576_v62 }
 0x244   :  { %407 = vadd.xlane.f32.xlu2 %v406_v63  ;;  %v578_v17 = vmul.f32 0.5, %v577_v9 }
 0x246   :  { %v579_v23 = vsub.f32 1.5, %v578_v17 }
 0x252   :  { %v344_v0 = vpop.permute.xlu1 %343 }
 0x253   :  { %v358_v1 = vsel %vm296_vm4, %v344_v0, 0.0 }
 0x254   :  { %359 = vadd.xlane.f32.xlu0 %v358_v1  ;;  %v574_v1 = vsel %vm573_vm10, %v1972_v20, %v570_v57 }
 0x255   :  { %v596_v10 = vmul.f32 %v574_v1, %v2362_v19  ;;  %v580_v19 = vmul.f32 %v1976_v56, %v579_v23 }
 0x257   :  { %v603_v16 = vmul.f32 %v2432_v43, %v596_v10  ;;  %v584_v7 = vsel %vm583_vm0, %v1976_v56, %v580_v19 }
 0x259   :  { %v610_v20 = vadd.f32 %v2445_v8, %v603_v16  ;;  %v646_v16 = vld [vmem:[%s2150_s14] sm:$0x3]  ;;  %s2903_s14 = sld [smem:[#allocation10_spill]] }
 0x25a   :  { %v390_v3 = vpop.permute.xlu1 %389  ;;  %v673_v23 = vperm.slane %v646_v16, 1 }
 0x25b   :  { %v403_v4 = vsel %vm296_vm4, %v390_v3, 0.0  ;;  %v587_v3 = vmul.f32 %v1974_v51, %v586_v59  ;;  %v1978_v59 = vpop.eup %1977  ;;  %vm655_vm4 = vcmask 254976  }
 0x25c   :  { %404 = vadd.xlane.f32.xlu0 %v403_v4  ;;  %vm631_vm2 = vweird.f32 %v1978_v59 }
 0x25d   :  { %v588_v15 = vmul.f32 0.5, %v587_v3 }
 0x26a   :  { %v302_v18 = vpop.xlane.xlu0 %301 }
 0x26b   :  { %v310_v12 = vmul.f32 0.0625, %v302_v18  ;;  %v589_v18 = vsub.f32 1.5, %v588_v15 }
 0x26d   :  { %v416_v4 = vmul.f32 %v2428_v40, %v310_v12  ;;  %v590_v24 = vmul.f32 %v1974_v51, %v589_v18 }
 0x27c   :  { %v2413_v29 = vpop.xlane.xlu2 %304 }
 0x285   :  { %v2415_v22 = vpop.xlane.xlu1 %307 }
 0x286   :  { %v312_v25 = vmul.f32 0.0625, %v2415_v22 }
 0x288   :  { %v418_v38 = vmul.f32 %v2428_v40, %v312_v25 }
 0x296   :  { %v351_v27 = vpop.xlane.xlu0 %350 }
 0x297   :  { %v361_v37 = vmul.f32 0.0625, %v351_v27 }
 0x299   :  { %v420_v44 = vmul.f32 %v2424_v35, %v361_v37  ;;  %v594_v37 = vsel %vm593_vm14, %v1974_v51, %v590_v24 }
 0x29b   :  { %v424_v53 = vadd.f32 %v420_v44, %v415_v48  ;;  %v598_v44 = vmul.f32 %v594_v37, %v2374_v33  ;;  %v1938_v37 = vld [vmem:[%s2155_s19] ss:$0 sm:$0xff]  ;;  %s2904_s19 = sld [smem:[#allocation11_spill]] }
 0x2a4   :  { %v2426_v39 = vpop.xlane.xlu1 %356 }
 0x2a5   :  { %v363_v41 = vmul.f32 0.0625, %v2426_v39  ;;  %v597_v39 = vmul.f32 %v584_v7, %v2352_v14 }
 0x2a7   :  { %v354_v28 = vpop.xlane.xlu2 %353  ;;  %v422_v51 = vmul.f32 %v2424_v35, %v363_v41 }
 0x2a8   :  { %v362_v58 = vmul.f32 0.0625, %v354_v28 }
 0x2aa   :  { %v421_v63 = vmul.f32 %v2424_v35, %v362_v58 }
 0x2ac   :  { %v425_v13 = vadd.f32 %v421_v63, %v416_v4 }
 0x2af   :  { %v399_v46 = vpop.xlane.xlu2 %398  ;;  %v402_v55 = vpop.xlane.xlu1 %401 }
 0x2b0   :  { %v409_v49 = vmul.f32 0.0625, %v399_v46  ;;  %v410_v61 = vmul.f32 0.0625, %v402_v55  ;;  %v311_v46 = vmul.f32 0.0625, %v2413_v29  ;;  %v604_v29 = vmul.f32 %v2432_v43, %v597_v39 }
 0x2b2   :  { %v429_v5 = vmul.f32 %v2437_v45, %v409_v49  ;;  %v430_v6 = vmul.f32 %v2437_v45, %v410_v61  ;;  %v417_v55 = vmul.f32 %v2428_v40, %v311_v46  ;;  %v627_v61 = vmul.f32 16.0, %v1978_v59 }
 0x2b4   :  { %v433_v11 = vadd.f32 %v429_v5, %v424_v53  ;;  %v434_v31 = vadd.f32 %v430_v6, %v425_v13  ;;  %v605_v5 = vmul.f32 %v2432_v43, %v598_v44  ;;  %v426_v58 = vadd.f32 %v422_v51, %v417_v55  ;;  %v647_v44 = vld [vmem:[%s2160_s24] sm:$0x3]  ;;  %s2905_s24 = sld [smem:[#allocation14_spill]] }
 0x2b5   :  { %v628_v1 = vsub.f32 1.0, %v627_v61  ;;  %v670_v46 = vperm.slane %v647_v44, 0  ;;  %v685_v50 = vperm.slane %v647_v44, 1  ;;  %v2573_v44 = vld [vmem:[%s2190_s1 + $0x68] sm:$0xff] }
 0x2b6   :  { %v441_v60 = vadd.f32 %v2442_v54, %v433_v11  ;;  %v442_v21 = vadd.f32 %v2442_v54, %v434_v31  ;;  %v612_v14 = vadd.f32 %v2445_v8, %v605_v5 }
 0x2b7   :  { %v408_v26 = vpop.xlane.xlu2 %407  ;;  %v629_v9 = vmul.f32 %v1978_v59, %v628_v1 }
 0x2b8   :  { %v2453_v0 = vadd.f32 %v609_v47, %v441_v60  ;;  %v2462_v27 = vadd.f32 %v610_v20, %v442_v21  ;;  %v412_v32 = vmul.f32 0.0625, %v408_v26  ;;  %v611_v60 = vadd.f32 %v2445_v8, %v604_v29 }
 0x2b9   :  { %v653_v20 = vperm.slane %v646_v16, 0 }
 0x2ba   :  { %v617_v22 = vsel %vm503_vm1, %v2453_v0, 0.0  ;;  %v618_v42 = vsel %vm503_vm1, %v2462_v27, 0.0  ;;  %v432_v34 = vmul.f32 %v2437_v45, %v412_v32 }
 0x2bb   :  { %v619_v49 = vadd.f32 %v618_v42, %v617_v22 }
 0x2bd   :  { %v620_v33 = vrot.slane %v619_v49, 4 }
 0x2c7   :  { %v360_v28 = vpop.xlane.xlu0 %359 }
 0x2c8   :  { %v364_v36 = vmul.f32 0.0625, %v360_v28 }
 0x2ca   :  { %v423_v30 = vmul.f32 %v2424_v35, %v364_v36  ;;  %v621_v35 = vadd.f32 %v620_v33, %v619_v49 }
 0x2cc   :  { %v427_v48 = vadd.f32 %v423_v30, %v418_v38  ;;  %v622_v43 = vrot.slane %v621_v35, 2 }
 0x2ce   :  { %v436_v52 = vadd.f32 %v432_v34, %v427_v48  ;;  %v623_v6 = vadd.f32 %v622_v43, %v621_v35  ;;  %v1939_v48 = vld [vmem:[%s2165_s28] ss:$0 sm:$0xff]  ;;  %s2906_s28 = sld [smem:[#allocation12_spill]] }
 0x2cf   :  { %v405_v53 = vpop.xlane.xlu0 %404 }
 0x2d0   :  { %v411_v56 = vmul.f32 0.0625, %v405_v53  ;;  %v444_v11 = vadd.f32 %v2442_v54, %v436_v52  ;;  %v624_v8 = vrot.slane %v623_v6, 1 }
 0x2d2   :  { %v431_v57 = vmul.f32 %v2437_v45, %v411_v56  ;;  %v2484_v47 = vadd.f32 %v612_v14, %v444_v11  ;;  %v625_v31 = vadd.f32 %v624_v8, %v623_v6 }
 0x2d4   :  { %v435_v12 = vadd.f32 %v431_v57, %v426_v58  ;;  %v635_v45 = vsel %vm503_vm1, %v2484_v47, 0.0 }
 0x2d6   :  { %v443_v40 = vadd.f32 %v2442_v54, %v435_v12  ;;  %v630_v54 = vadd.f32 %v1978_v59, %v629_v9 }
 0x2d8   :  { %v2488_v62 = vadd.f32 %v611_v60, %v443_v40  ;;  %v2495_v18 = vsel %vm631_vm2, %v1978_v59, %v630_v54 }
 0x2d9   :  { %v633_v24 = vmul.f32 %v2495_v18, %v625_v31 }
 0x2da   :  { %v634_v63 = vsel %vm503_vm1, %v2488_v62, 0.0 }
 0x2db   :  { %v636_v3 = vadd.f32 %v635_v45, %v634_v63 }
 0x2dd   :  { %v637_v4 = vrot.slane %v636_v3, 4 }
 0x2df   :  { %v638_v10 = vadd.f32 %v637_v4, %v636_v3 }
 0x2e1   :  { %v639_v13 = vrot.slane %v638_v10, 2 }
 0x2e3   :  { %v640_v15 = vadd.f32 %v639_v13, %v638_v10 }
 0x2e5   :  { %v641_v17 = vrot.slane %v640_v15, 1 }
 0x2e7   :  { %v642_v21 = vadd.f32 %v641_v17, %v640_v15 }
 0x2e9   :  { %v643_v25 = vmul.f32 %v642_v21, %v2495_v18 }
 0x2eb   :  { %v645_v26 = vsel %vm644_vm3, %v633_v24, %v643_v25 }
 0x2ec   :  { %v674_v19 = vmul.f32 %v673_v23, %v645_v26  ;;  %v654_v28 = vmul.f32 %v653_v20, %v645_v26 }
 0x2ee   :  { %v675_v32 = vsel %vm655_vm4, %v674_v19, 0.0  ;;  %v656_v36 = vsel %vm655_vm4, %v654_v28, 0.0 }
 0x2ef   :  { %676 = vadd.xlane.f32.xlu0 %v675_v32  ;;  %657 = vadd.xlane.f32.xlu1 %v656_v36  ;;  %v2552_v32 = vld [vmem:[%s2190_s1 + $0x60] sm:$0xff]  ;;  %v2557_v36 = vld [vmem:[%s2190_s1 + $0x48] sm:$0xff] }
 0x362   :  { %v677_v38 = vpop.xlane.xlu0 %676  ;;  %v658_v41 = vpop.xlane.xlu1 %657 }
 0x363   :  { %v678_v22 = vadd.f32 %v1938_v37, %v677_v38  ;;  %v663_v42 = vadd.f32 %v1938_v37, %v658_v41  ;;  %v2560_v37 = vld [vmem:[%s2190_s1 + $0x70] sm:$0xff]  ;;  %v1868_v41 = vld [vmem:[%s2180_s18 + $0x8] sm:$0xff] }
 0x364   :  { %851 = vmatpush.bf16.msra.mxu1 %v1868_v41 }
 0x365   :  { %v679_v30 = vmax.f32 %v678_v22, 0.0  ;;  %v664_v7 = vmax.f32 %v663_v42, 0.0 }
 0x367   :  { %682 = vperm.xlu1 %1930, %v679_v30   ;;  %667 = vperm.xlu2 %1929, %v664_v7   ;;  %v1867_v30 = vld [vmem:[%s2180_s18] sm:$0xff]  ;;  %s2907_s18 = sld [smem:[#allocation13_spill]] }
 0x368   :  { %v2570_v7 = vld [vmem:[%s2190_s1 + $0x20] sm:$0xff]  ;;  %852 = vmatpush.bf16.msra.mxu1 %v1867_v30 }
 0x3c1   :  { %v668_v34 = vpop.permute.xlu2 %667 }
 0x3c2   :  { %v671_v49 = vmul.f32 %v670_v46, %v668_v34 }
 0x3c4   :  { %v672_v51 = vadd.f32 %v1939_v48, %v671_v49 }
 0x3d9   :  { %v683_v39 = vpop.permute.xlu1 %682 }
 0x3da   :  { %v686_v52 = vmul.f32 %v685_v50, %v683_v39  ;;  %v2581_v39 = vld [vmem:[%s2190_s1 + $0x78] sm:$0xff] }
 0x3dc   :  { %v687_v53 = vadd.f32 %v686_v52, %v672_v51  ;;  %v2584_v51 = vld [vmem:[%s2190_s1 + $0x10] sm:$0xff] }
 0x3de   :  { %v1790_v5 = vmul.f32 -1.442695, %v687_v53  ;;  %v2591_v53 = vld [vmem:[%s2190_s1 + $0x50] sm:$0xff] }
 0x3e0   :  { %1979 = vpow2.f32 %v1790_v5 }
 0x3e6   :  { %v1980_v55 = vpop.eup %1979 }
 0x3e7   :  { %v691_v56 = vadd.f32 1.0, %v1980_v55 }
 0x3e9   :  { %1981 = vrcp.f32 %v691_v56  ;;  %v703_v11 = vand.u32 2147483648, %v691_v56  ;;  %v701_v59 = vand.u32 2147483647, %v691_v56  ;;  %vm697_vm6 = vweird.f32 %v691_v56 }
 0x3eb   :  { %v704_v12 = vor.u32 1.1754944e-38, %v703_v11  ;;  %vm702_vm8 = vcmp.eq.f32.partialorder %v701_v59, 8.507059e+37  ;;  %v2597_v11 = vld [vmem:[%s2190_s1 + $0x58] sm:$0xff] }
 0x3ef   :  { %v1982_v33 = vpop.eup %1981 }
 0x3f0   :  { %v693_v29 = vmul.f32 %v1982_v33, %v691_v56  ;;  %vm698_vm5 = vweird.f32 %v1982_v33 }
 0x3f1   :  { %vm699_vm7 = vmor %vm697_vm6, %vm698_vm5 }
 0x3f2   :  { %v694_v58 = vsub.f32 1.0, %v693_v29 }
 0x3f4   :  { %v695_v57 = vmul.f32 %v1982_v33, %v694_v58 }
 0x3f6   :  { %v696_v14 = vadd.f32 %v1982_v33, %v695_v57  ;;  %v2600_v57 = vld [vmem:[%s2190_s1] sm:$0xff] }
 0x3f8   :  { %v700_v35 = vsel %vm699_vm7, %v1982_v33, %v696_v14 }
 0x3f9   :  { %v705_v60 = vsel %vm702_vm8, %v704_v12, %v700_v35  ;;  %v2603_v12 = vld [vmem:[%s2190_s1 + $0x40] sm:$0xff] }
 0x3fa   :  { %v710_v40 = vperm.slane %v705_v60, 1  ;;  %v707_v61 = vperm.slane %v705_v60, 0 }
 0x3fc   :  { %v2504_v43 = vmul.f32 %v710_v40, %v2484_v47  ;;  %v2507_v63 = vmul.f32 %v707_v61, %v2453_v0  ;;  %v2514_v3 = vmul.f32 %v707_v61, %v2462_v27  ;;  %v2519_v47 = vmul.f32 %v710_v40, %v2488_v62 }
 0x3fe   :  { %v724_v45 = vsel %vm503_vm1, %v2504_v43, 0.0  ;;  %v715_v1 = vsel %vm503_vm1, %v2507_v63, 0.0  ;;  %v718_v4 = vsel %vm503_vm1, %v2514_v3, 0.0  ;;  %v721_v0 = vsel %vm503_vm1, %v2519_v47, 0.0 }
 0x3ff   :  { %725 = vadd.xlane.f32.xlu2 %v724_v45  ;;  %716 = vadd.xlane.f32.xlu0 %v715_v1 }
 0x407   :  { %719 = vadd.xlane.f32.xlu0 %v718_v4 }
 0x40f   :  { %722 = vadd.xlane.f32.xlu0 %v721_v0 }
 0x417   :  { %930 = vrot.lane.b32.xlu2 %v2581_v39, %s2094_s9 }
 0x41f   :  { %922 = vrot.lane.b32.xlu2 %v2597_v11, %s2094_s9 }
 0x472   :  { %v717_v6 = vpop.xlane.xlu0 %716  ;;  %v726_v17 = vpop.xlane.xlu2 %725 }
 0x473   :  { %v727_v9 = vmul.f32 %v717_v6, %v2341_v2  ;;  %v730_v23 = vmul.f32 %v726_v17, %v2341_v2 }
 0x475   :  { %v2525_v10 = vsub.f32 %v2507_v63, %v727_v9  ;;  %v2545_v25 = vsub.f32 %v2504_v43, %v730_v23  ;;  %v1940_v9 = vld [vmem:[%s2899_s21] ss:$0 sm:$0xff] }
 0x477   :  { %v735_v27 = vmul.f32 %v2525_v10, %v2525_v10  ;;  %v738_v19 = vmul.f32 %v2545_v25, %v2545_v25 }
 0x479   :  { %v739_v8 = vsel %vm503_vm1, %v735_v27, 0.0  ;;  %v748_v28 = vsel %vm503_vm1, %v738_v19, 0.0  ;;  %v2615_v27 = vld [vmem:[%s2190_s1 + $0x30] sm:$0xff] }
 0x47a   :  { %740 = vadd.xlane.f32.xlu1 %v739_v8  ;;  %v720_v13 = vpop.xlane.xlu0 %719  ;;  %912 = vrot.lane.b32.xlu2 %v2615_v27, %s2094_s9 }
 0x47b   :  { %v728_v62 = vmul.f32 %v720_v13, %v2341_v2 }
 0x47d   :  { %v2532_v54 = vsub.f32 %v2514_v3, %v728_v62  ;;  %v2618_v62 = vld [vmem:[%s2190_s1 + $0x38] sm:$0xff] }
 0x47f   :  { %v736_v15 = vmul.f32 %v2532_v54, %v2532_v54 }
 0x481   :  { %v742_v31 = vsel %vm503_vm1, %v736_v15, 0.0 }
 0x482   :  { %743 = vadd.xlane.f32.xlu0 %v742_v31  ;;  %v723_v16 = vpop.xlane.xlu0 %722 }
 0x483   :  { %v729_v21 = vmul.f32 %v723_v16, %v2341_v2  ;;  %v1941_v16 = vld [vmem:[%s2900_s25] ss:$0 sm:$0xff] }
 0x485   :  { %v2540_v20 = vsub.f32 %v2519_v47, %v729_v21 }
 0x487   :  { %v737_v24 = vmul.f32 %v2540_v20, %v2540_v20 }
 0x489   :  { %v745_v26 = vsel %vm503_vm1, %v737_v24, 0.0 }
 0x48a   :  { %746 = vadd.xlane.f32.xlu0 %v745_v26 }
 0x492   :  { %749 = vadd.xlane.f32.xlu0 %v748_v28 }
 0x493   :  { %924 = vrot.lane.b32.xlu1 %v2552_v32, %s2094_s9 }
 0x49b   :  { %918 = vrot.lane.b32.xlu1 %v2557_v36, %s2094_s9 }
 0x4a3   :  { %908 = vrot.lane.b32.xlu1 %v2570_v7, %s2094_s9 }
 0x4a6   :  { %928 = vrot.lane.b32.xlu0 %v2560_v37, %s2094_s9 }
 0x4ab   :  { %904 = vrot.lane.b32.xlu1 %v2584_v51, %s2094_s9 }
 0x4ae   :  { %926 = vrot.lane.b32.xlu0 %v2573_v44, %s2094_s9 }
 0x4b3   :  { %900 = vrot.lane.b32.xlu1 %v2600_v57, %s2094_s9 }
 0x4b6   :  { %920 = vrot.lane.b32.xlu0 %v2591_v53, %s2094_s9 }
 0x4be   :  { %916 = vrot.lane.b32.xlu0 %v2603_v12, %s2094_s9 }
 0x4c6   :  { %914 = vrot.lane.b32.xlu0 %v2618_v62, %s2094_s9 }
 0x4ed   :  { %v741_v38 = vpop.xlane.xlu1 %740 }
 0x4ee   :  { %v751_v22 = vmul.f32 %v741_v38, %v2341_v2  ;;  %v2627_v38 = vld [vmem:[%s2190_s1 + $0x28] sm:$0xff] }
 0x4ef   :  { %910 = vrot.lane.b32.xlu2 %v2627_v38, %s2094_s9 }
 0x4f0   :  { %v755_v42 = vadd.f32 1e-05, %v751_v22 }
 0x4f2   :  { %1983 = vrsqrt.f32 %v755_v42  ;;  %vm765_vm10 = vweird.f32 %v755_v42 }
 0x4f5   :  { %v744_v46 = vpop.xlane.xlu0 %743 }
 0x4f6   :  { %v752_v34 = vmul.f32 %v744_v46, %v2341_v2 }
 0x4f8   :  { %v1984_v48 = vpop.eup %1983  ;;  %v756_v49 = vadd.f32 1e-05, %v752_v34 }
 0x4f9   :  { %v760_v50 = vmul.f32 %v1984_v48, %v755_v42  ;;  %vm766_vm9 = vweird.f32 %v1984_v48 }
 0x4fa   :  { %1985 = vrsqrt.f32 %v756_v49  ;;  %vm767_vm11 = vmor %vm765_vm10, %vm766_vm9  ;;  %vm775_vm13 = vweird.f32 %v756_v49 }
 0x4fb   :  { %v761_v52 = vmul.f32 %v1984_v48, %v760_v50 }
 0x4fd   :  { %v762_v5 = vmul.f32 0.5, %v761_v52  ;;  %v747_v55 = vpop.xlane.xlu0 %746 }
 0x4fe   :  { %v753_v56 = vmul.f32 %v747_v55, %v2341_v2 }
 0x4ff   :  { %v763_v33 = vsub.f32 1.5, %v762_v5 }
 0x500   :  { %v1986_v29 = vpop.eup %1985  ;;  %v757_v58 = vadd.f32 1e-05, %v753_v56 }
 0x501   :  { %v764_v59 = vmul.f32 %v1984_v48, %v763_v33  ;;  %v770_v14 = vmul.f32 %v1986_v29, %v756_v49  ;;  %vm776_vm12 = vweird.f32 %v1986_v29  ;;  %v2634_v49 = vld [vmem:[%s2190_s1 + $0x18] sm:$0xff] }
 0x502   :  { %1987 = vrsqrt.f32 %v757_v58  ;;  %vm777_vm14 = vmor %vm775_vm13, %vm776_vm12  ;;  %vm785_vm0 = vweird.f32 %v757_v58  ;;  %906 = vrot.lane.b32.xlu2 %v2634_v49, %s2094_s9 }
 0x503   :  { %v771_v35 = vmul.f32 %v1986_v29, %v770_v14  ;;  %v768_v60 = vsel %vm767_vm11, %v1984_v48, %v764_v59  ;;  %v931_v14 = vpop.permute.xlu2 %930 }
 0x504   :  { %v799_v0 = vmul.f32 %v768_v60, %v2525_v10 }
 0x505   :  { %v772_v40 = vmul.f32 0.5, %v771_v35  ;;  %v750_v61 = vpop.xlane.xlu0 %749 }
 0x506   :  { %v754_v45 = vmul.f32 %v750_v61, %v2341_v2  ;;  %v806_v10 = vmul.f32 %v1940_v9, %v799_v0 }
 0x507   :  { %v773_v1 = vsub.f32 1.5, %v772_v40  ;;  %v925_v40 = vpop.permute.xlu1 %924 }
 0x508   :  { %v1988_v4 = vpop.eup %1987  ;;  %v758_v6 = vadd.f32 1e-05, %v754_v45  ;;  %v813_v19 = vadd.f32 %v1941_v16, %v806_v10 }
 0x509   :  { %v774_v8 = vmul.f32 %v1986_v29, %v773_v1  ;;  %v780_v13 = vmul.f32 %v1988_v4, %v757_v58  ;;  %vm786_vm15 = vweird.f32 %v1988_v4  ;;  %v2640_v58 = vld [vmem:[%s2190_s1 + $0x8] sm:$0xff]  ;;  %s2908_s1 = sld [smem:[#allocation16_spill]] }
 0x50a   :  { %1989 = vrsqrt.f32 %v758_v6  ;;  %vm787_vm2 = vmor %vm785_vm0, %vm786_vm15  ;;  %vm795_vm5 = vweird.f32 %v758_v6  ;;  %902 = vrot.lane.b32.xlu2 %v2640_v58, %s2094_s9 }
 0x50b   :  { %v778_v15 = vsel %vm777_vm14, %v1986_v29, %v774_v8  ;;  %v781_v31 = vmul.f32 %v1988_v4, %v780_v13  ;;  %v923_v60 = vpop.permute.xlu2 %922 }
 0x50c   :  { %v800_v17 = vmul.f32 %v778_v15, %v2532_v54 }
 0x50d   :  { %v782_v21 = vmul.f32 0.5, %v781_v31 }
 0x50e   :  { %v807_v23 = vmul.f32 %v1940_v9, %v800_v17 }
 0x50f   :  { %v783_v24 = vsub.f32 1.5, %v782_v21  ;;  %v919_v1 = vpop.permute.xlu1 %918 }
 0x510   :  { %v1990_v26 = vpop.eup %1989  ;;  %v814_v28 = vadd.f32 %v1941_v16, %v807_v23 }
 0x511   :  { %v784_v41 = vmul.f32 %v1988_v4, %v783_v24  ;;  %v790_v22 = vmul.f32 %v1990_v26, %v758_v6  ;;  %vm796_vm4 = vweird.f32 %v1990_v26 }
 0x512   :  { %v817_v42 = vpack.c.bf16 %v814_v28, %v813_v19  ;;  %vm797_vm6 = vmor %vm795_vm5, %vm796_vm4 }
 0x513   :  { %v791_v54 = vmul.f32 %v1990_v26, %v790_v22  ;;  %v788_v30 = vsel %vm787_vm2, %v1988_v4, %v784_v41  ;;  %v913_v45 = vpop.permute.xlu2 %912  ;;  %v1942_v4 = vld [vmem:[%s2901_s29] ss:$0 sm:$0xff] }
 0x514   :  { %1799 = vmatmul.msk.bf16.vlgmr.msra.gmra.mxu1 %vm503_vm1, %v817_v42  ;;  %v801_v48 = vmul.f32 %v788_v30, %v2540_v20 }
 0x515   :  { %v792_v46 = vmul.f32 0.5, %v791_v54 }
 0x516   :  { %v808_v55 = vmul.f32 %v1940_v9, %v801_v48 }
 0x517   :  { %v793_v34 = vsub.f32 1.5, %v792_v46  ;;  %v909_v17 = vpop.permute.xlu1 %908 }
 0x518   :  { %v815_v33 = vadd.f32 %v1941_v16, %v808_v55  ;;  %v929_v20 = vpop.permute.xlu0 %928 }
 0x519   :  { %v794_v50 = vmul.f32 %v1990_v26, %v793_v34 }
 0x51b   :  { %v798_v52 = vsel %vm797_vm6, %v1990_v26, %v794_v50 }
 0x51c   :  { %v802_v5 = vmul.f32 %v798_v52, %v2545_v25 }
 0x51e   :  { %v809_v56 = vmul.f32 %v1940_v9, %v802_v5 }
 0x51f   :  { %v905_v24 = vpop.permute.xlu1 %904 }
 0x520   :  { %v816_v29 = vadd.f32 %v1941_v16, %v809_v56  ;;  %v927_v35 = vpop.permute.xlu0 %926 }
 0x522   :  { %v818_v59 = vpack.c.bf16 %v816_v29, %v815_v33 }
 0x524   :  { %1800 = vmatmul.msk.bf16.gmra.mxu1 %vm503_vm1, %v818_v59 }
 0x527   :  { %v901_v5 = vpop.permute.xlu1 %900 }
 0x528   :  { %v921_v61 = vpop.permute.xlu0 %920 }
 0x530   :  { %v917_v6 = vpop.permute.xlu0 %916 }
 0x538   :  { %v915_v19 = vpop.permute.xlu0 %914 }
 0x549   :  { %v911_v13 = vpop.permute.xlu2 %910 }
 0x55c   :  { %v907_v21 = vpop.permute.xlu2 %906 }
 0x564   :  { %v903_v52 = vpop.permute.xlu2 %902 }
 0x591   :  { %v854_v25 = vpop.f32.mrf.mxu1 }
 0x592   :  { %v2646_v0 = vadd.f32 %v1942_v4, %v854_v25 }
 0x594   :  { %v956_v15 = vmul.f32 %v917_v6, %v2646_v0  ;;  %v960_v33 = vmul.f32 %v925_v40, %v2646_v0  ;;  %v948_v29 = vmul.f32 %v901_v5, %v2646_v0 }
 0x599   :  { %v856_v9 = vpop.f32.mrf.mxu1 }
 0x59a   :  { %v2648_v8 = vadd.f32 %v1942_v4, %v856_v9 }
 0x59c   :  { %v957_v31 = vmul.f32 %v919_v1, %v2648_v8  ;;  %v961_v55 = vmul.f32 %v927_v35, %v2648_v8  ;;  %v949_v56 = vmul.f32 %v903_v52, %v2648_v8  ;;  %v953_v40 = vmul.f32 %v911_v13, %v2648_v8 }
 0x59e   :  { %v968_v10 = vpack.c.bf16 %v957_v31, %v956_v15  ;;  %v970_v59 = vpack.c.bf16 %v961_v55, %v960_v33 }
 0x5a0   :  { %1066 = vrot.lane.b32.xlu1 %v968_v10, %s2092_s5 }
 0x5a1   :  { %v859_v16 = vpop.f32.mrf.mxu1 }
 0x5a2   :  { %v2653_v23 = vadd.f32 %v1942_v4, %v859_v16 }
 0x5a4   :  { %v954_v41 = vmul.f32 %v913_v45, %v2653_v23  ;;  %v962_v22 = vmul.f32 %v929_v20, %v2653_v23  ;;  %v950_v30 = vmul.f32 %v905_v24, %v2653_v23  ;;  %v964_v20 = vpack.c.bf16 %v949_v56, %v948_v29 }
 0x5a5   :  { %v958_v35 = vmul.f32 %v921_v61, %v2653_v23  ;;  %v952_v45 = vmul.f32 %v909_v17, %v2646_v0 }
 0x5a7   :  { %v966_v1 = vpack.c.bf16 %v953_v40, %v952_v45  ;;  %v865_v45 = vmul.f32 0.35355338, %v2648_v8 }
 0x5a9   :  { %v861_v26 = vpop.f32.mrf.mxu1 }
 0x5aa   :  { %v2655_v28 = vadd.f32 %v1942_v4, %v861_v26 }
 0x5ac   :  { %v955_v42 = vmul.f32 %v915_v19, %v2655_v28  ;;  %v963_v54 = vmul.f32 %v931_v14, %v2655_v28  ;;  %v951_v46 = vmul.f32 %v907_v21, %v2655_v28  ;;  %v959_v14 = vmul.f32 %v923_v60, %v2655_v28 }
 0x5ae   :  { %v967_v34 = vpack.c.bf16 %v955_v42, %v954_v41  ;;  %v971_v48 = vpack.c.bf16 %v963_v54, %v962_v22  ;;  %v965_v50 = vpack.c.bf16 %v951_v46, %v950_v30  ;;  %v969_v25 = vpack.c.bf16 %v959_v14, %v958_v35 }
 0x5b0   :  { %1072 = vrot.lane.b32.xlu0 %v971_v48, %s2092_s5  ;;  %1060 = vrot.lane.b32.xlu1 %v965_v50, %s2092_s5 }
 0x5b1   :  { %1064 = vrot.lane.b32.xlu2 %v967_v34, %s2092_s5 }
 0x5b8   :  { %1070 = vrot.lane.b32.xlu0 %v970_v59, %s2092_s5  ;;  %1002 = vrot.lane.b32.xlu1 %v2581_v39, %s2097_s3 }
 0x5b9   :  { %1058 = vrot.lane.b32.xlu2 %v964_v20, %s2092_s5 }
 0x5c0   :  { %1068 = vrot.lane.b32.xlu0 %v969_v25, %s2092_s5  ;;  %992 = vrot.lane.b32.xlu1 %v2591_v53, %s2097_s3 }
 0x5c1   :  { %996 = vrot.lane.b32.xlu2 %v2552_v32, %s2097_s3 }
 0x5c8   :  { %1062 = vrot.lane.b32.xlu0 %v966_v1, %s2092_s5  ;;  %990 = vrot.lane.b32.xlu1 %v2557_v36, %s2097_s3 }
 0x5c9   :  { %994 = vrot.lane.b32.xlu2 %v2597_v11, %s2097_s3 }
 0x5d0   :  { %1000 = vrot.lane.b32.xlu0 %v2560_v37, %s2097_s3  ;;  %980 = vrot.lane.b32.xlu1 %v2570_v7, %s2097_s3 }
 0x5d1   :  { %984 = vrot.lane.b32.xlu2 %v2615_v27, %s2097_s3 }
 0x5d8   :  { %998 = vrot.lane.b32.xlu0 %v2573_v44, %s2097_s3  ;;  %978 = vrot.lane.b32.xlu1 %v2634_v49, %s2097_s3 }
 0x5d9   :  { %982 = vrot.lane.b32.xlu2 %v2627_v38, %s2097_s3 }
 0x5e0   :  { %988 = vrot.lane.b32.xlu0 %v2603_v12, %s2097_s3 }
 0x5e1   :  { %972 = vrot.lane.b32.xlu2 %v2600_v57, %s2097_s3 }
 0x5e8   :  { %986 = vrot.lane.b32.xlu0 %v2618_v62, %s2097_s3 }
 0x5f0   :  { %976 = vrot.lane.b32.xlu0 %v2584_v51, %s2097_s3 }
 0x5f8   :  { %974 = vrot.lane.b32.xlu0 %v2640_v58, %s2097_s3 }
 0x60b   :  { %v1065_v60 = vpop.permute.xlu2 %1064 }
 0x60c   :  { %v1090_v46 = vsel %vm503_vm1, %v1065_v60, 0 }
 0x612   :  { %v1067_v61 = vpop.permute.xlu1 %1066 }
 0x613   :  { %v1059_v4 = vpop.permute.xlu2 %1058  ;;  %v1093_v54 = vsel %vm503_vm1, %v1067_v61, 0  ;;  %v864_v61 = vmul.f32 0.35355338, %v2646_v0 }
 0x614   :  { %v1081_v25 = vsel %vm503_vm1, %v1059_v4, 0 }
 0x61b   :  { %v997_v15 = vpop.permute.xlu2 %996 }
 0x61c   :  { %v1032_v48 = vmul.f32 %v997_v15, %v2646_v0 }
 0x622   :  { %v1061_v6 = vpop.permute.xlu1 %1060  ;;  %v1073_v9 = vpop.permute.xlu0 %1072 }
 0x623   :  { %v1102_v13 = vsel %vm503_vm1, %v1073_v9, 0  ;;  %v995_v16 = vpop.permute.xlu2 %994  ;;  %v1084_v59 = vsel %vm503_vm1, %v1061_v6, 0  ;;  %v1044_v9 = vpack.c.bf16 %v865_v45, %v864_v61  ;;  %v1049_v45 = vld [vmem:[%s2902_s8 + $0x18] sm:$0xff]  ;;  %v1198_v61 = vpack.c.bf16 %v2627_v38, %v2570_v7 }
 0x624   :  { %1104 = vmatpush.bf16.xpose.msra.mxu2 %v1102_v13  ;;  %v1031_v26 = vmul.f32 %v995_v16, %v2655_v28 }
 0x62a   :  { %v1003_v31 = vpop.permute.xlu1 %1002  ;;  %v1071_v17 = vpop.permute.xlu0 %1070 }
 0x62b   :  { %v1099_v10 = vsel %vm503_vm1, %v1071_v17, 0  ;;  %v1035_v35 = vmul.f32 %v1003_v31, %v2655_v28  ;;  %v985_v1 = vpop.permute.xlu2 %984 }
 0x62c   :  { %1105 = vmatpush.bf16.xpose.msra.mxu2 %v1099_v10  ;;  %v1026_v13 = vmul.f32 %v985_v1, %v2653_v23 }
 0x632   :  { %v993_v21 = vpop.permute.xlu1 %992  ;;  %v1069_v24 = vpop.permute.xlu0 %1068 }
 0x633   :  { %v1030_v19 = vmul.f32 %v993_v21, %v2653_v23  ;;  %v1096_v41 = vsel %vm503_vm1, %v1069_v24, 0  ;;  %v983_v4 = vpop.permute.xlu2 %982  ;;  %v867_v24 = vmul.f32 0.35355338, %v2655_v28 }
 0x634   :  { %1106 = vmatpush.bf16.xpose.msra.mxu2 %v1096_v41  ;;  %v1025_v10 = vmul.f32 %v983_v4, %v2648_v8 }
 0x635   :  { %v1041_v22 = vpack.c.bf16 %v1031_v26, %v1030_v19  ;;  %v866_v26 = vmul.f32 0.35355338, %v2653_v23 }
 0x637   :  { %1163 = vrot.lane.b32.xlu0 %v1041_v22, %s2097_s3  ;;  %v1045_v22 = vpack.c.bf16 %v867_v24, %v866_v26  ;;  %v1869_v26 = vld [vmem:[%s2903_s14] sm:$0xff] }
 0x63a   :  { %v1063_v42 = vpop.permute.xlu0 %1062  ;;  %v991_v55 = vpop.permute.xlu1 %990 }
 0x63b   :  { %v1087_v52 = vsel %vm503_vm1, %v1063_v42, 0  ;;  %v1029_v33 = vmul.f32 %v991_v55, %v2648_v8 }
 0x63c   :  { %1107 = vmatpush.bf16.xpose.msra.mxu2 %v1093_v54 }
 0x642   :  { %v1001_v30 = vpop.permute.xlu0 %1000  ;;  %v981_v31 = vpop.permute.xlu1 %980 }
 0x643   :  { %v1034_v14 = vmul.f32 %v1001_v30, %v2653_v23  ;;  %v1024_v17 = vmul.f32 %v981_v31, %v2646_v0 }
 0x644   :  { %1108 = vmatpush.bf16.xpose.msra.mxu2 %v1090_v46  ;;  %v973_v46 = vpop.permute.xlu2 %972 }
 0x645   :  { %v1043_v40 = vpack.c.bf16 %v1035_v35, %v1034_v14  ;;  %v1038_v21 = vpack.c.bf16 %v1025_v10, %v1024_v17 }
 0x64a   :  { %v999_v34 = vpop.permute.xlu0 %998  ;;  %v979_v19 = vpop.permute.xlu1 %978 }
 0x64b   :  { %v1033_v50 = vmul.f32 %v999_v34, %v2648_v8  ;;  %v1023_v42 = vmul.f32 %v979_v19, %v2655_v28 }
 0x64c   :  { %1109 = vmatpush.bf16.xpose.msra.mxu2 %v1087_v52 }
 0x64d   :  { %v1042_v5 = vpack.c.bf16 %v1033_v50, %v1032_v48  ;;  %v1020_v48 = vmul.f32 %v973_v46, %v2646_v0 }
 0x64f   :  { %1165 = vrot.lane.b32.xlu2 %v1042_v5, %s2097_s3 }
 0x652   :  { %v989_v56 = vpop.permute.xlu0 %988 }
 0x653   :  { %v1028_v29 = vmul.f32 %v989_v56, %v2646_v0  ;;  %v1202_v0 = vpack.c.bf16 %v2573_v44, %v2552_v32  ;;  %v1048_v32 = vld [vmem:[%s2902_s8 + $0x10] sm:$0xff] }
 0x654   :  { %1110 = vmatpush.bf16.xpose.msra.mxu2 %v1084_v59 }
 0x655   :  { %v1040_v20 = vpack.c.bf16 %v1029_v33, %v1028_v29  ;;  %v1046_v33 = vld [vmem:[%s2902_s8] sm:$0xff] }
 0x657   :  { %1161 = vrot.lane.b32.xlu1 %v1040_v20, %s2097_s3  ;;  %v1201_v20 = vpack.c.bf16 %v2597_v11, %v2591_v53  ;;  %v1200_v53 = vpack.c.bf16 %v2557_v36, %v2603_v12  ;;  %v1199_v11 = vpack.c.bf16 %v2618_v62, %v2615_v27  ;;  %v1870_v36 = vld [vmem:[%s2903_s14 + $0x8] sm:$0xff] }
 0x658   :  { %1265 = vmatpush.bf16.msrb.mxu0 %v1870_v36 }
 0x65a   :  { %v987_v60 = vpop.permute.xlu0 %986 }
 0x65b   :  { %v1027_v6 = vmul.f32 %v987_v60, %v2655_v28 }
 0x65c   :  { %1111 = vmatpush.bf16.xpose.msra.mxu2 %v1081_v25  ;;  %1266 = vmatpush.bf16.msrb.mxu0 %v1869_v26 }
 0x65d   :  { %v1039_v15 = vpack.c.bf16 %v1027_v6, %v1026_v13  ;;  %v1197_v6 = vpack.c.bf16 %v2634_v49, %v2584_v51 }
 0x65f   :  { %1167 = vrot.lane.b32.xlu1 %v1043_v40, %s2097_s3 }
 0x662   :  { %v977_v16 = vpop.permute.xlu0 %976 }
 0x663   :  { %1801 = vmatmul.msk.bf16.vlgmr.msra.gmra.mxu2 %vm503_vm1, %v1044_v9  ;;  %v1022_v41 = vmul.f32 %v977_v16, %v2653_v23  ;;  %v1196_v9 = vpack.c.bf16 %v2640_v58, %v2600_v57 }
 0x665   :  { %v1037_v54 = vpack.c.bf16 %v1023_v42, %v1022_v41 }
 0x667   :  { %1159 = vrot.lane.b32.xlu1 %v1039_v15, %s2097_s3 }
 0x66a   :  { %v975_v30 = vpop.permute.xlu0 %974 }
 0x66b   :  { %v1021_v34 = vmul.f32 %v975_v30, %v2648_v8  ;;  %v1203_v8 = vpack.c.bf16 %v2581_v39, %v2560_v37  ;;  %v1047_v37 = vld [vmem:[%s2902_s8 + $0x8] sm:$0xff] }
 0x66d   :  { %v1036_v50 = vpack.c.bf16 %v1021_v34, %v1020_v48  ;;  %1204 = vmatpush.bf16.msrb.mxu1 %v1203_v8 }
 0x66f   :  { %1157 = vrot.lane.b32.xlu1 %v1038_v21, %s2097_s3 }
 0x671   :  { %1205 = vmatpush.bf16.msrb.mxu1 %v1202_v0 }
 0x673   :  { %1802 = vmatmul.msk.bf16.gmra.mxu2 %vm503_vm1, %v1045_v22 }
 0x675   :  { %1206 = vmatpush.bf16.msrb.mxu1 %v1201_v20 }
 0x677   :  { %1155 = vrot.lane.b32.xlu1 %v1037_v54, %s2097_s3 }
 0x679   :  { %1207 = vmatpush.bf16.msrb.mxu1 %v1200_v53 }
 0x67d   :  { %1208 = vmatpush.bf16.msrb.mxu1 %v1199_v11 }
 0x67f   :  { %1153 = vrot.lane.b32.xlu1 %v1036_v50, %s2097_s3 }
 0x681   :  { %1209 = vmatpush.bf16.msrb.mxu1 %v1198_v61 }
 0x685   :  { %1210 = vmatpush.bf16.msrb.mxu1 %v1197_v6 }
 0x689   :  { %1211 = vmatpush.bf16.msrb.mxu1 %v1196_v9 }
 0x6a9   :  { %v1166_v5 = vpop.permute.xlu2 %1165  ;;  %v1164_v28 = vpop.permute.xlu0 %1163 }
 0x6c9   :  { %v1162_v52 = vpop.permute.xlu1 %1161 }
 0x6d1   :  { %v1168_v23 = vpop.permute.xlu1 %1167 }
 0x6d2   :  { %1177 = vmatpush.bf16.msra.mxu3 %v1168_v23 }
 0x6d6   :  { %1178 = vmatpush.bf16.msra.mxu3 %v1166_v5 }
 0x6d9   :  { %v1160_v55 = vpop.permute.xlu1 %1159 }
 0x6da   :  { %1179 = vmatpush.bf16.msra.mxu3 %v1164_v28 }
 0x6de   :  { %1180 = vmatpush.bf16.msra.mxu3 %v1162_v52 }
 0x6e1   :  { %v1158_v56 = vpop.permute.xlu1 %1157 }
 0x6e2   :  { %1181 = vmatpush.bf16.msra.mxu3 %v1160_v55 }
 0x6e6   :  { %v1113_v29 = vpop.f32.mrf.mxu2  ;;  %1182 = vmatpush.bf16.msra.mxu3 %v1158_v56 }
 0x6e7   :  { %v1114_v59 = vadd.f32 %v1113_v29, %v1046_v33  ;;  %v1943_v33 = vld [vmem:[%s2904_s19] ss:$0 sm:$0xff] }
 0x6e9   :  { %1123 = vmax.xlane.f32.xlu2 %v1114_v59  ;;  %v1156_v14 = vpop.permute.xlu1 %1155 }
 0x6ea   :  { %1183 = vmatpush.bf16.msra.mxu3 %v1156_v14 }
 0x6ee   :  { %v1115_v39 = vpop.f32.mrf.mxu2 }
 0x6ef   :  { %v1116_v35 = vadd.f32 %v1115_v39, %v1047_v37 }
 0x6f1   :  { %1125 = vmax.xlane.f32.xlu0 %v1116_v35  ;;  %v1154_v25 = vpop.permute.xlu1 %1153 }
 0x6f2   :  { %1184 = vmatpush.bf16.msra.mxu3 %v1154_v25 }
 0x6f6   :  { %v1118_v44 = vpop.f32.mrf.mxu2 }
 0x6f7   :  { %v1119_v40 = vadd.f32 %v1118_v44, %v1048_v32 }
 0x6f9   :  { %1127 = vmax.xlane.f32.xlu1 %v1119_v40 }
 0x6fe   :  { %v1120_v1 = vpop.f32.mrf.mxu2 }
 0x6ff   :  { %v1121_v60 = vadd.f32 %v1120_v1, %v1049_v45 }
 0x701   :  { %1129 = vmax.xlane.f32.xlu2 %v1121_v60 }
 0x75c   :  { %v1124_v13 = vpop.xlane.xlu2 %1123 }
 0x75d   :  { %v1131_v15 = vsub.f32 %v1114_v59, %v1124_v13 }
 0x75f   :  { %v1135_v12 = vmul.f32 1.442695, %v1131_v15 }
 0x761   :  { %1991 = vpow2.f32 %v1135_v12 }
 0x764   :  { %v1126_v31 = vpop.xlane.xlu0 %1125 }
 0x765   :  { %v1132_v27 = vsub.f32 %v1116_v35, %v1126_v31 }
 0x767   :  { %v1137_v62 = vmul.f32 1.442695, %v1132_v27  ;;  %v1992_v38 = vpop.eup %1991 }
 0x769   :  { %1993 = vpow2.f32 %v1137_v62 }
 0x76c   :  { %v1128_v7 = vpop.xlane.xlu1 %1127 }
 0x76d   :  { %v1133_v51 = vsub.f32 %v1119_v40, %v1128_v7 }
 0x76f   :  { %v1994_v4 = vpop.eup %1993  ;;  %v1139_v57 = vmul.f32 1.442695, %v1133_v51 }
 0x770   :  { %v1143_v49 = vpack.c.bf16 %v1994_v4, %v1992_v38 }
 0x771   :  { %1995 = vpow2.f32 %v1139_v57 }
 0x772   :  { %1185 = vmatmul.bf16.vlgmr.msra.gmra.mxu3 %v1143_v49  ;;  %1212 = vmatmul.bf16.vlgmr.msrb.gmra.mxu1 %v1143_v49 }
 0x774   :  { %v1130_v58 = vpop.xlane.xlu2 %1129 }
 0x775   :  { %v1134_v17 = vsub.f32 %v1121_v60, %v1130_v58  ;;  %v1872_v58 = vld [vmem:[%s2905_s24 + $0x8] sm:$0xff] }
 0x776   :  { %1420 = vmatpush.bf16.msrb.mxu3 %v1872_v58 }
 0x777   :  { %v1141_v10 = vmul.f32 1.442695, %v1134_v17  ;;  %v1996_v16 = vpop.eup %1995 }
 0x779   :  { %1997 = vpow2.f32 %v1141_v10 }
 0x77f   :  { %v1998_v21 = vpop.eup %1997 }
 0x780   :  { %v1144_v24 = vpack.c.bf16 %v1998_v21, %v1996_v16  ;;  %v1871_v21 = vld [vmem:[%s2905_s24] sm:$0xff] }
 0x781   :  { %1421 = vmatpush.bf16.msrb.mxu3 %v1871_v21  ;;  %v1877_v21 = vld [vmem:[%s2908_s1 + $0x20] sm:$0xff] }
 0x782   :  { %1190 = vmatmul.bf16.gmra.mxu3 %v1144_v24  ;;  %1217 = vmatmul.bf16.gmra.mxu1 %v1144_v24 }
 0x7ef   :  { %v1213_v19 = vpop.f32.mrf.mxu1 }
 0x7f0   :  { %1999 = vrcp.f32 %v1213_v19 }
 0x7f5   :  { %v1186_v41 = vpop.f32.mrf.mxu3 }
 0x7f6   :  { %v2000_v42 = vpop.eup %1999 }
 0x7f7   :  { %v1215_v22 = vpop.f32.mrf.mxu1  ;;  %v1227_v46 = vmul.f32 %v2000_v42, %v1186_v41 }
 0x7f8   :  { %2001 = vrcp.f32 %v1215_v22 }
 0x7fd   :  { %v1188_v54 = vpop.f32.mrf.mxu3 }
 0x7fe   :  { %v2002_v30 = vpop.eup %2001 }
 0x7ff   :  { %v1228_v34 = vmul.f32 %v2002_v30, %v1188_v54  ;;  %v1218_v48 = vpop.f32.mrf.mxu1 }
 0x800   :  { %2003 = vrcp.f32 %v1218_v48 }
 0x801   :  { %v1231_v50 = vpack.c.bf16 %v1228_v34, %v1227_v46 }
 0x803   :  { %1811 = vmatmul.msk.bf16.vlgmr.msrb.gmra.mxu0 %vm503_vm1, %v1231_v50 }
 0x805   :  { %v1191_v52 = vpop.f32.mrf.mxu3 }
 0x806   :  { %v2004_v5 = vpop.eup %2003 }
 0x807   :  { %v1220_v23 = vpop.f32.mrf.mxu1  ;;  %v1229_v56 = vmul.f32 %v2004_v5, %v1191_v52 }
 0x808   :  { %2005 = vrcp.f32 %v1220_v23 }
 0x80d   :  { %v1193_v28 = vpop.f32.mrf.mxu3 }
 0x80e   :  { %v2006_v55 = vpop.eup %2005 }
 0x80f   :  { %v1230_v8 = vmul.f32 %v2006_v55, %v1193_v28 }
 0x811   :  { %v1232_v0 = vpack.c.bf16 %v1230_v8, %v1229_v56 }
 0x813   :  { %1812 = vmatmul.msk.bf16.gmra.mxu0 %vm503_vm1, %v1232_v0 }
 0x880   :  { %v1268_v29 = vpop.f32.mrf.mxu0 }
 0x881   :  { %v1269_v59 = vadd.f32 %v1943_v33, %v1268_v29 }
 0x883   :  { %v2774_v20 = vadd.f32 %v1269_v59, %v2507_v63 }
 0x885   :  { %v1284_v14 = vsel %vm503_vm1, %v2774_v20, 0.0 }
 0x886   :  { %1285 = vadd.xlane.f32.xlu0 %v1284_v14  ;;  %v1944_v14 = vld [vmem:[%s2906_s28] ss:$0 sm:$0xff] }
 0x888   :  { %v1270_v37 = vpop.f32.mrf.mxu0 }
 0x889   :  { %v1271_v39 = vadd.f32 %v1943_v33, %v1270_v37 }
 0x88b   :  { %v2779_v35 = vadd.f32 %v1271_v39, %v2514_v3 }
 0x88d   :  { %v1287_v25 = vsel %vm503_vm1, %v2779_v35, 0.0 }
 0x88e   :  { %1288 = vadd.xlane.f32.xlu2 %v1287_v25 }
 0x890   :  { %v1273_v32 = vpop.f32.mrf.mxu0 }
 0x891   :  { %v1274_v44 = vadd.f32 %v1943_v33, %v1273_v32 }
 0x893   :  { %v2784_v40 = vadd.f32 %v1274_v44, %v2519_v47 }
 0x895   :  { %v1290_v63 = vsel %vm503_vm1, %v2784_v40, 0.0 }
 0x896   :  { %1291 = vadd.xlane.f32.xlu0 %v1290_v63 }
 0x898   :  { %v1275_v45 = vpop.f32.mrf.mxu0 }
 0x899   :  { %v1276_v1 = vadd.f32 %v1943_v33, %v1275_v45  ;;  %v1945_v45 = vld [vmem:[%s2907_s18] ss:$0 sm:$0xff] }
 0x89b   :  { %v2789_v60 = vadd.f32 %v1276_v1, %v2504_v43 }
 0x89d   :  { %v1293_v3 = vsel %vm503_vm1, %v2789_v60, 0.0 }
 0x89e   :  { %1294 = vadd.xlane.f32.xlu2 %v1293_v3 }
 0x8f9   :  { %v1286_v53 = vpop.xlane.xlu0 %1285 }
 0x8fa   :  { %v1296_v11 = vmul.f32 %v1286_v53, %v2341_v2 }
 0x8fc   :  { %v1300_v61 = vsub.f32 %v2774_v20, %v1296_v11 }
 0x8fe   :  { %v1304_v47 = vmul.f32 %v1300_v61, %v1300_v61 }
 0x900   :  { %v1308_v6 = vsel %vm503_vm1, %v1304_v47, 0.0 }
 0x901   :  { %v1289_v9 = vpop.xlane.xlu2 %1288  ;;  %1309 = vadd.xlane.f32.xlu0 %v1308_v6 }
 0x902   :  { %v1297_v13 = vmul.f32 %v1289_v9, %v2341_v2 }
 0x904   :  { %v1301_v15 = vsub.f32 %v2779_v35, %v1297_v13 }
 0x906   :  { %v1305_v43 = vmul.f32 %v1301_v15, %v1301_v15 }
 0x908   :  { %v1311_v36 = vsel %vm503_vm1, %v1305_v43, 0.0 }
 0x909   :  { %1312 = vadd.xlane.f32.xlu2 %v1311_v36  ;;  %v1292_v12 = vpop.xlane.xlu0 %1291 }
 0x90a   :  { %v1298_v31 = vmul.f32 %v1292_v12, %v2341_v2 }
 0x90c   :  { %v2801_v27 = vsub.f32 %v2784_v40, %v1298_v31 }
 0x90e   :  { %v1306_v62 = vmul.f32 %v2801_v27, %v2801_v27 }
 0x910   :  { %v1314_v7 = vsel %vm503_vm1, %v1306_v62, 0.0 }
 0x911   :  { %v1295_v38 = vpop.xlane.xlu2 %1294  ;;  %1315 = vadd.xlane.f32.xlu0 %v1314_v7 }
 0x912   :  { %v1299_v4 = vmul.f32 %v1295_v38, %v2341_v2 }
 0x914   :  { %v2808_v51 = vsub.f32 %v2789_v60, %v1299_v4 }
 0x916   :  { %v1307_v49 = vmul.f32 %v2808_v51, %v2808_v51 }
 0x918   :  { %v1317_v57 = vsel %vm503_vm1, %v1307_v49, 0.0 }
 0x919   :  { %1318 = vadd.xlane.f32.xlu2 %v1317_v57 }
 0x974   :  { %v1310_v17 = vpop.xlane.xlu0 %1309 }
 0x975   :  { %v1320_v10 = vmul.f32 %v1310_v17, %v2341_v2 }
 0x977   :  { %v1324_v16 = vadd.f32 1e-05, %v1320_v10  ;;  %v1879_v10 = vld [vmem:[%s2908_s1 + $0x30] sm:$0xff] }
 0x979   :  { %2007 = vrsqrt.f32 %v1324_v16  ;;  %vm1334_vm8 = vweird.f32 %v1324_v16 }
 0x97c   :  { %v1313_v24 = vpop.xlane.xlu2 %1312 }
 0x97d   :  { %v1321_v26 = vmul.f32 %v1313_v24, %v2341_v2  ;;  %v1875_v24 = vld [vmem:[%s2908_s1 + $0x10] sm:$0xff] }
 0x97f   :  { %v2008_v19 = vpop.eup %2007  ;;  %v1325_v41 = vadd.f32 1e-05, %v1321_v26  ;;  %v1946_v26 = vld [vmem:[%s2909_s20] ss:$0 sm:$0xff] }
 0x980   :  { %v1329_v22 = vmul.f32 %v2008_v19, %v1324_v16  ;;  %vm1335_vm7 = vweird.f32 %v2008_v19  ;;  %v1878_v16 = vld [vmem:[%s2908_s1 + $0x28] sm:$0xff] }
 0x981   :  { %2009 = vrsqrt.f32 %v1325_v41  ;;  %vm1336_vm9 = vmor %vm1334_vm8, %vm1335_vm7  ;;  %vm1344_vm11 = vweird.f32 %v1325_v41 }
 0x982   :  { %v1330_v42 = vmul.f32 %v2008_v19, %v1329_v22 }
 0x984   :  { %v1331_v54 = vmul.f32 0.5, %v1330_v42  ;;  %v1316_v30 = vpop.xlane.xlu0 %1315  ;;  %v1873_v42 = vld [vmem:[%s2908_s1] sm:$0xff] }
 0x985   :  { %v1322_v46 = vmul.f32 %v1316_v30, %v2341_v2 }
 0x986   :  { %v1332_v34 = vsub.f32 1.5, %v1331_v54 }
 0x987   :  { %v2010_v48 = vpop.eup %2009  ;;  %v1326_v50 = vadd.f32 1e-05, %v1322_v46 }
 0x988   :  { %v1333_v52 = vmul.f32 %v2008_v19, %v1332_v34  ;;  %v1339_v23 = vmul.f32 %v2010_v48, %v1325_v41  ;;  %vm1345_vm10 = vweird.f32 %v2010_v48 }
 0x989   :  { %2011 = vrsqrt.f32 %v1326_v50  ;;  %vm1346_vm12 = vmor %vm1344_vm11, %vm1345_vm10  ;;  %vm1354_vm14 = vweird.f32 %v1326_v50 }
 0x98a   :  { %v1340_v5 = vmul.f32 %v2010_v48, %v1339_v23  ;;  %v1337_v28 = vsel %vm1336_vm9, %v2008_v19, %v1333_v52  ;;  %v1874_v19 = vld [vmem:[%s2908_s1 + $0x8] sm:$0xff] }
 0x98b   :  { %v1368_v29 = vmul.f32 %v1337_v28, %v1300_v61 }
 0x98c   :  { %v1341_v55 = vmul.f32 0.5, %v1340_v5  ;;  %v1319_v56 = vpop.xlane.xlu2 %1318 }
 0x98d   :  { %v1323_v8 = vmul.f32 %v1319_v56, %v2341_v2  ;;  %v1375_v63 = vmul.f32 %v1944_v14, %v1368_v29 }
 0x98e   :  { %v1342_v0 = vsub.f32 1.5, %v1341_v55 }
 0x98f   :  { %v2012_v33 = vpop.eup %2011  ;;  %v1327_v59 = vadd.f32 1e-05, %v1323_v8  ;;  %v1382_v47 = vadd.f32 %v1945_v45, %v1375_v63 }
 0x990   :  { %v1343_v37 = vmul.f32 %v2010_v48, %v1342_v0  ;;  %v1349_v39 = vmul.f32 %v2012_v33, %v1326_v50  ;;  %vm1355_vm13 = vweird.f32 %v2012_v33 }
 0x991   :  { %2013 = vrsqrt.f32 %v1327_v59  ;;  %vm1356_vm15 = vmor %vm1354_vm14, %vm1355_vm13  ;;  %vm1364_vm2 = vweird.f32 %v1327_v59 }
 0x992   :  { %v1347_v25 = vsel %vm1346_vm12, %v2010_v48, %v1343_v37  ;;  %v1350_v32 = vmul.f32 %v2012_v33, %v1349_v39 }
 0x993   :  { %v1369_v44 = vmul.f32 %v1347_v25, %v1301_v15 }
 0x994   :  { %v1351_v1 = vmul.f32 0.5, %v1350_v32 }
 0x995   :  { %v1376_v3 = vmul.f32 %v1944_v14, %v1369_v44 }
 0x996   :  { %v1352_v53 = vsub.f32 1.5, %v1351_v1 }
 0x997   :  { %v2014_v11 = vpop.eup %2013  ;;  %v1383_v6 = vadd.f32 %v1945_v45, %v1376_v3 }
 0x998   :  { %v1353_v9 = vmul.f32 %v2012_v33, %v1352_v53  ;;  %v1359_v61 = vmul.f32 %v2014_v11, %v1327_v59  ;;  %vm1365_vm0 = vweird.f32 %v2014_v11 }
 0x999   :  { %v1386_v13 = vpack.c.bf16 %v1383_v6, %v1382_v47  ;;  %vm1366_vm4 = vmor %vm1364_vm2, %vm1365_vm0 }
 0x99a   :  { %v1360_v43 = vmul.f32 %v2014_v11, %v1359_v61  ;;  %v1357_v36 = vsel %vm1356_vm15, %v2012_v33, %v1353_v9 }
 0x99b   :  { %1821 = vmatmul.msk.bf16.vlgmr.msrb.gmra.mxu3 %vm503_vm1, %v1386_v13  ;;  %v1370_v31 = vmul.f32 %v1357_v36, %v2801_v27  ;;  %v1880_v27 = vld [vmem:[%s2908_s1 + $0x38] sm:$0xff] }
 0x99c   :  { %v1361_v15 = vmul.f32 0.5, %v1360_v43  ;;  %1539 = vmatpush.bf16.msra.mxu1 %v1880_v27 }
 0x99d   :  { %v1377_v4 = vmul.f32 %v1944_v14, %v1370_v31 }
 0x99e   :  { %v1362_v12 = vsub.f32 1.5, %v1361_v15 }
 0x99f   :  { %v1384_v57 = vadd.f32 %v1945_v45, %v1377_v4 }
 0x9a0   :  { %v1363_v62 = vmul.f32 %v2014_v11, %v1362_v12  ;;  %1540 = vmatpush.bf16.msra.mxu1 %v1879_v10 }
 0x9a2   :  { %v1367_v7 = vsel %vm1366_vm4, %v2014_v11, %v1363_v62 }
 0x9a3   :  { %v1371_v38 = vmul.f32 %v1367_v7, %v2808_v51  ;;  %v1876_v51 = vld [vmem:[%s2908_s1 + $0x18] sm:$0xff] }
 0x9a4   :  { %1541 = vmatpush.bf16.msra.mxu1 %v1878_v16 }
 0x9a5   :  { %v1378_v49 = vmul.f32 %v1944_v14, %v1371_v38 }
 0x9a7   :  { %v1385_v58 = vadd.f32 %v1945_v45, %v1378_v49 }
 0x9a8   :  { %1542 = vmatpush.bf16.msra.mxu1 %v1877_v21 }
 0x9a9   :  { %v1387_v17 = vpack.c.bf16 %v1385_v58, %v1384_v57  ;;  %v1947_v57 = vld [vmem:[%s2910_s22] ss:$0 sm:$0xff] }
 0x9ab   :  { %1822 = vmatmul.msk.bf16.gmra.mxu3 %vm503_vm1, %v1387_v17 }
 0x9ac   :  { %1543 = vmatpush.bf16.msra.mxu1 %v1876_v51 }
 0x9b0   :  { %1544 = vmatpush.bf16.msra.mxu1 %v1875_v24 }
 0x9b4   :  { %1545 = vmatpush.bf16.msra.mxu1 %v1874_v19 }
 0x9b8   :  { %1546 = vmatpush.bf16.msra.mxu1 %v1873_v42 }
 0xa1e   :  { %v1423_v41 = vpop.f32.mrf.mxu3 }
 0xa1f   :  { %v1424_v22 = vadd.f32 %v1946_v26, %v1423_v41 }
 0xa21   :  { %v1433_v54 = vmul.f32 %v1424_v22, %v1424_v22 }
 0xa23   :  { %v1437_v30 = vmul.f32 %v1433_v54, %v1424_v22 }
 0xa25   :  { %v1441_v46 = vmul.f32 0.044715, %v1437_v30 }
 0xa26   :  { %v1425_v34 = vpop.f32.mrf.mxu3 }
 0xa27   :  { %v1445_v48 = vadd.f32 %v1441_v46, %v1424_v22  ;;  %v1426_v50 = vadd.f32 %v1946_v26, %v1425_v34 }
 0xa29   :  { %v1449_v52 = vmul.f32 0.7978846, %v1445_v48  ;;  %v1434_v23 = vmul.f32 %v1426_v50, %v1426_v50 }
 0xa2b   :  { %v1438_v5 = vmul.f32 %v1434_v23, %v1426_v50  ;;  %2015 = vtanh.f32 %v1449_v52 }
 0xa2d   :  { %v1442_v28 = vmul.f32 0.044715, %v1438_v5 }
 0xa2e   :  { %v1428_v55 = vpop.f32.mrf.mxu3 }
 0xa2f   :  { %v1446_v56 = vadd.f32 %v1442_v28, %v1426_v50  ;;  %v1429_v8 = vadd.f32 %v1946_v26, %v1428_v55 }
 0xa31   :  { %v1450_v0 = vmul.f32 0.7978846, %v1446_v56  ;;  %v1435_v33 = vmul.f32 %v1429_v8, %v1429_v8  ;;  %v2016_v29 = vpop.eup %2015 }
 0xa32   :  { %v1457_v37 = vadd.f32 1.0, %v2016_v29 }
 0xa33   :  { %2017 = vtanh.f32 %v1450_v0  ;;  %v1439_v59 = vmul.f32 %v1435_v33, %v1429_v8 }
 0xa34   :  { %v1461_v1 = vmul.f32 0.5, %v1457_v37 }
 0xa35   :  { %v1443_v14 = vmul.f32 0.044715, %v1439_v59 }
 0xa36   :  { %v1430_v39 = vpop.f32.mrf.mxu3  ;;  %v1465_v6 = vmul.f32 %v1461_v1, %v1424_v22 }
 0xa37   :  { %v1447_v25 = vadd.f32 %v1443_v14, %v1429_v8  ;;  %v1431_v32 = vadd.f32 %v1946_v26, %v1430_v39 }
 0xa39   :  { %v2018_v44 = vpop.eup %2017  ;;  %v1436_v63 = vmul.f32 %v1431_v32, %v1431_v32  ;;  %v1451_v45 = vmul.f32 0.7978846, %v1447_v25 }
 0xa3a   :  { %v1458_v3 = vadd.f32 1.0, %v2018_v44 }
 0xa3b   :  { %v1440_v53 = vmul.f32 %v1436_v63, %v1431_v32  ;;  %2019 = vtanh.f32 %v1451_v45 }
 0xa3c   :  { %v1462_v11 = vmul.f32 0.5, %v1458_v3 }
 0xa3d   :  { %v1444_v47 = vmul.f32 0.044715, %v1440_v53 }
 0xa3e   :  { %v1466_v9 = vmul.f32 %v1462_v11, %v1426_v50 }
 0xa3f   :  { %v1448_v61 = vadd.f32 %v1444_v47, %v1431_v32 }
 0xa40   :  { %v1469_v13 = vpack.c.bf16 %v1466_v9, %v1465_v6 }
 0xa41   :  { %v1452_v43 = vmul.f32 0.7978846, %v1448_v61  ;;  %v2020_v36 = vpop.eup %2019 }
 0xa42   :  { %1547 = vmatmul.bf16.vlgmr.msra.gmra.mxu1 %v1469_v13  ;;  %v1459_v15 = vadd.f32 1.0, %v2020_v36 }
 0xa43   :  { %2021 = vtanh.f32 %v1452_v43 }
 0xa44   :  { %v1463_v62 = vmul.f32 0.5, %v1459_v15 }
 0xa46   :  { %v1467_v38 = vmul.f32 %v1463_v62, %v1429_v8 }
 0xa49   :  { %v2022_v12 = vpop.eup %2021 }
 0xa4a   :  { %v1460_v31 = vadd.f32 1.0, %v2022_v12 }
 0xa4c   :  { %v1464_v7 = vmul.f32 0.5, %v1460_v31 }
 0xa4e   :  { %v1468_v4 = vmul.f32 %v1464_v7, %v1431_v32 }
 0xa50   :  { %v1470_v49 = vpack.c.bf16 %v1468_v4, %v1467_v38 }
 0xa52   :  { %1552 = vmatmul.bf16.gmra.mxu1 %v1470_v49  ;;  %v1948_v49 = vld [vmem:[%s2911_s23] ss:$0 sm:$0xff] }
 0xabf   :  { %v1548_v58 = vpop.f32.mrf.mxu1 }
 0xac0   :  { %v1549_v17 = vadd.f32 %v1947_v57, %v1548_v58 }
 0xac2   :  { %v1558_v27 = vadd.f32 %v1549_v17, %v2774_v20 }
 0xac4   :  { %v1564_v10 = vsel %vm503_vm1, %v1558_v27, 0.0 }
 0xac5   :  { %1565 = vadd.xlane.f32.xlu0 %v1564_v10  ;;  %v1882_v10 = vld [vmem:[%s2250_s4 + $0x8] sm:$0xff] }
 0xac6   :  { %1717 = vmatpush.bf16.msra.mxu0 %v1882_v10 }
 0xac7   :  { %v1550_v16 = vpop.f32.mrf.mxu1 }
 0xac8   :  { %v1551_v21 = vadd.f32 %v1947_v57, %v1550_v16 }
 0xaca   :  { %v1559_v51 = vadd.f32 %v1551_v21, %v2779_v35 }
 0xacc   :  { %v1567_v24 = vsel %vm503_vm1, %v1559_v51, 0.0 }
 0xacd   :  { %1568 = vadd.xlane.f32.xlu1 %v1567_v24  ;;  %v1949_v24 = vld [vmem:[%s2245_s13] ss:$0 sm:$0xff] }
 0xacf   :  { %v1553_v26 = vpop.f32.mrf.mxu1 }
 0xad0   :  { %v1554_v19 = vadd.f32 %v1947_v57, %v1553_v26 }
 0xad2   :  { %v1560_v41 = vadd.f32 %v1554_v19, %v2784_v40 }
 0xad4   :  { %v1570_v22 = vsel %vm503_vm1, %v1560_v41, 0.0 }
 0xad5   :  { %1571 = vadd.xlane.f32.xlu2 %v1570_v22 }
 0xad7   :  { %v1555_v42 = vpop.f32.mrf.mxu1 }
 0xad8   :  { %v1556_v54 = vadd.f32 %v1947_v57, %v1555_v42 }
 0xada   :  { %v1561_v20 = vadd.f32 %v1556_v54, %v2789_v60 }
 0xadc   :  { %v1573_v30 = vsel %vm503_vm1, %v1561_v20, 0.0 }
 0xadd   :  { %1574 = vadd.xlane.f32.xlu0 %v1573_v30 }
 0xb38   :  { %v1566_v46 = vpop.xlane.xlu0 %1565 }
 0xb39   :  { %v1576_v35 = vmul.f32 %v1566_v46, %v2341_v2 }
 0xb3b   :  { %v1580_v34 = vsub.f32 %v1558_v27, %v1576_v35 }
 0xb3d   :  { %v1584_v48 = vmul.f32 %v1580_v34, %v1580_v34 }
 0xb3f   :  { %v1588_v50 = vsel %vm503_vm1, %v1584_v48, 0.0 }
 0xb40   :  { %v1569_v52 = vpop.xlane.xlu1 %1568  ;;  %1589 = vadd.xlane.f32.xlu1 %v1588_v50 }
 0xb41   :  { %v1577_v40 = vmul.f32 %v1569_v52, %v2341_v2 }
 0xb43   :  { %v1581_v23 = vsub.f32 %v1559_v51, %v1577_v40  ;;  %v1881_v51 = vld [vmem:[%s2250_s4] sm:$0xff]  ;;  %s2098_s4 = smov [#allocation3]  }
 0xb44   :  { %1718 = vmatpush.bf16.msra.mxu0 %v1881_v51  ;;  %s1730_s13 = sshll.u32 %s2098_s4, 4  ;;  %s1731_s13 = int_to_ptr.vmem [resolvable:$true] %s1730_s13 }
 0xb45   :  { %v1585_v5 = vmul.f32 %v1581_v23, %v1581_v23 }
 0xb47   :  { %v1591_v28 = vsel %vm503_vm1, %v1585_v5, 0.0 }
 0xb48   :  { %1592 = vadd.xlane.f32.xlu2 %v1591_v28  ;;  %v1572_v60 = vpop.xlane.xlu2 %1571 }
 0xb49   :  { %v1578_v55 = vmul.f32 %v1572_v60, %v2341_v2 }
 0xb4b   :  { %v2848_v56 = vsub.f32 %v1560_v41, %v1578_v55 }
 0xb4d   :  { %v1586_v8 = vmul.f32 %v2848_v56, %v2848_v56 }
 0xb4f   :  { %v1594_v0 = vsel %vm503_vm1, %v1586_v8, 0.0 }
 0xb50   :  { %1595 = vadd.xlane.f32.xlu0 %v1594_v0  ;;  %v1575_v33 = vpop.xlane.xlu0 %1574 }
 0xb51   :  { %v1579_v29 = vmul.f32 %v1575_v33, %v2341_v2 }
 0xb53   :  { %v2854_v59 = vsub.f32 %v1561_v20, %v1579_v29 }
 0xb55   :  { %v1587_v14 = vmul.f32 %v2854_v59, %v2854_v59 }
 0xb57   :  { %v1597_v37 = vsel %vm503_vm1, %v1587_v14, 0.0 }
 0xb58   :  { %1598 = vadd.xlane.f32.xlu1 %v1597_v37 }
 0xbb3   :  { %v1590_v39 = vpop.xlane.xlu1 %1589 }
 0xbb4   :  { %v1600_v25 = vmul.f32 %v1590_v39, %v2341_v2 }
 0xbb6   :  { %v1604_v32 = vadd.f32 1e-05, %v1600_v25 }
 0xbb8   :  { %2023 = vrsqrt.f32 %v1604_v32  ;;  %vm1614_vm6 = vweird.f32 %v1604_v32 }
 0xbbb   :  { %v1593_v44 = vpop.xlane.xlu2 %1592 }
 0xbbc   :  { %v1601_v63 = vmul.f32 %v1593_v44, %v2341_v2 }
 0xbbe   :  { %v2024_v45 = vpop.eup %2023  ;;  %v1605_v1 = vadd.f32 1e-05, %v1601_v63 }
 0xbbf   :  { %v1609_v3 = vmul.f32 %v2024_v45, %v1604_v32  ;;  %vm1615_vm5 = vweird.f32 %v2024_v45 }
 0xbc0   :  { %2025 = vrsqrt.f32 %v1605_v1  ;;  %vm1616_vm7 = vmor %vm1614_vm6, %vm1615_vm5  ;;  %vm1624_vm9 = vweird.f32 %v1605_v1 }
 0xbc1   :  { %v1610_v53 = vmul.f32 %v2024_v45, %v1609_v3 }
 0xbc3   :  { %v1611_v11 = vmul.f32 0.5, %v1610_v53  ;;  %v1596_v47 = vpop.xlane.xlu0 %1595 }
 0xbc4   :  { %v1602_v6 = vmul.f32 %v1596_v47, %v2341_v2 }
 0xbc5   :  { %v1612_v9 = vsub.f32 1.5, %v1611_v11 }
 0xbc6   :  { %v2026_v61 = vpop.eup %2025  ;;  %v1606_v13 = vadd.f32 1e-05, %v1602_v6 }
 0xbc7   :  { %v1613_v43 = vmul.f32 %v2024_v45, %v1612_v9  ;;  %v1619_v36 = vmul.f32 %v2026_v61, %v1605_v1  ;;  %vm1625_vm8 = vweird.f32 %v2026_v61 }
 0xbc8   :  { %2027 = vrsqrt.f32 %v1606_v13  ;;  %vm1626_vm10 = vmor %vm1624_vm9, %vm1625_vm8  ;;  %vm1634_vm12 = vweird.f32 %v1606_v13 }
 0xbc9   :  { %v1620_v15 = vmul.f32 %v2026_v61, %v1619_v36  ;;  %v1617_v12 = vsel %vm1616_vm7, %v2024_v45, %v1613_v43  ;;  %v1950_v43 = vld [vmem:[%s2255_s10] ss:$0 sm:$0xff] }
 0xbca   :  { %v1648_v57 = vmul.f32 %v1617_v12, %v1580_v34 }
 0xbcb   :  { %v1621_v31 = vmul.f32 0.5, %v1620_v15  ;;  %v1599_v62 = vpop.xlane.xlu1 %1598 }
 0xbcc   :  { %v1603_v7 = vmul.f32 %v1599_v62, %v2341_v2  ;;  %v1655_v2 = vmul.f32 %v1948_v49, %v1648_v57 }
 0xbcd   :  { %v1622_v38 = vsub.f32 1.5, %v1621_v31 }
 0xbce   :  { %v2028_v4 = vpop.eup %2027  ;;  %v1607_v58 = vadd.f32 1e-05, %v1603_v7  ;;  %v1662_v54 = vadd.f32 %v1949_v24, %v1655_v2 }
 0xbcf   :  { %v1623_v17 = vmul.f32 %v2026_v61, %v1622_v38  ;;  %v1629_v27 = vmul.f32 %v2028_v4, %v1606_v13  ;;  %vm1635_vm11 = vweird.f32 %v2028_v4 }
 0xbd0   :  { %2029 = vrsqrt.f32 %v1607_v58  ;;  %vm1636_vm13 = vmor %vm1634_vm12, %vm1635_vm11  ;;  %v1666_v50 = vsel %vm503_vm1, %v1662_v54, 0.0  ;;  %vm1644_vm15 = vweird.f32 %v1607_v58 }
 0xbd1   :  { %v1627_v16 = vsel %vm1626_vm10, %v2026_v61, %v1623_v17  ;;  %v1630_v21 = vmul.f32 %v2028_v4, %v1629_v27 }
 0xbd2   :  { %v1649_v26 = vmul.f32 %v1627_v16, %v1581_v23 }
 0xbd3   :  { %v1631_v19 = vmul.f32 0.5, %v1630_v21 }
 0xbd4   :  { %v1656_v41 = vmul.f32 %v1948_v49, %v1649_v26 }
 0xbd5   :  { %v1632_v22 = vsub.f32 1.5, %v1631_v19 }
 0xbd6   :  { %v2030_v42 = vpop.eup %2029  ;;  %v1663_v20 = vadd.f32 %v1949_v24, %v1656_v41 }
 0xbd7   :  { %v1633_v30 = vmul.f32 %v2028_v4, %v1632_v22  ;;  %v1639_v46 = vmul.f32 %v2030_v42, %v1607_v58  ;;  %vm1645_vm14 = vweird.f32 %v2030_v42 }
 0xbd8   :  { %v1667_v35 = vsel %vm503_vm1, %v1663_v20, 0.0  ;;  %vm1646_vm0 = vmor %vm1644_vm15, %vm1645_vm14 }
 0xbd9   :  { %v1637_v34 = vsel %vm1636_vm13, %v2028_v4, %v1633_v30  ;;  %v1640_v48 = vmul.f32 %v2030_v42, %v1639_v46  ;;  %v1668_v52 = vadd.f32 %v1667_v35, %v1666_v50 }
 0xbda   :  { %v1650_v23 = vmul.f32 %v1637_v34, %v2848_v56 }
 0xbdb   :  { %v1641_v40 = vmul.f32 0.5, %v1640_v48  ;;  %v1669_v28 = vrot.slane %v1668_v52, 4 }
 0xbdc   :  { %v1657_v55 = vmul.f32 %v1948_v49, %v1650_v23 }
 0xbdd   :  { %v1642_v5 = vsub.f32 1.5, %v1641_v40  ;;  %v1670_v33 = vadd.f32 %v1669_v28, %v1668_v52 }
 0xbde   :  { %v1664_v29 = vadd.f32 %v1949_v24, %v1657_v55 }
 0xbdf   :  { %v1643_v60 = vmul.f32 %v2030_v42, %v1642_v5  ;;  %v1671_v39 = vrot.slane %v1670_v33, 2 }
 0xbe0   :  { %v1676_v25 = vsel %vm503_vm1, %v1664_v29, 0.0 }
 0xbe1   :  { %v1647_v8 = vsel %vm1646_vm0, %v2030_v42, %v1643_v60  ;;  %v1672_v63 = vadd.f32 %v1671_v39, %v1670_v33 }
 0xbe2   :  { %v1651_v0 = vmul.f32 %v1647_v8, %v2854_v59 }
 0xbe3   :  { %v1673_v3 = vrot.slane %v1672_v63, 1 }
 0xbe4   :  { %v1658_v14 = vmul.f32 %v1948_v49, %v1651_v0 }
 0xbe5   :  { %v1674_v11 = vadd.f32 %v1673_v3, %v1672_v63 }
 0xbe6   :  { %v1665_v37 = vadd.f32 %v1949_v24, %v1658_v14 }
 0xbe7   :  { %v1675_v6 = vmul.f32 %v1674_v11, %v2495_v18 }
 0xbe8   :  { %v1677_v32 = vsel %vm503_vm1, %v1665_v37, 0.0 }
 0xbe9   :  { %v1678_v56 = vadd.f32 %v1677_v32, %v1676_v25 }
 0xbeb   :  { %v1679_v44 = vrot.slane %v1678_v56, 4 }
 0xbed   :  { %v1680_v45 = vadd.f32 %v1679_v44, %v1678_v56 }
 0xbef   :  { %v1681_v1 = vrot.slane %v1680_v45, 2 }
 0xbf1   :  { %v1682_v53 = vadd.f32 %v1681_v1, %v1680_v45 }
 0xbf3   :  { %v1683_v59 = vrot.slane %v1682_v53, 1 }
 0xbf5   :  { %v1684_v47 = vadd.f32 %v1683_v59, %v1682_v53 }
 0xbf7   :  { %v1685_v9 = vmul.f32 %v1684_v47, %v2495_v18 }
 0xbf9   :  { %v1686_v61 = vsel %vm644_vm3, %v1675_v6, %v1685_v9 }
 0xbfa   :  { %v1687_v13 = vpack.c.bf16 %v1686_v61, %v1686_v61 }
 0xbfc   :  { %1863 = vmatmul.msk.bf16.vlgmr.msra.gmra.mxu0 %vm503_vm1, %v1687_v13 }
 0xc79   :  { %v1720_v36 = vpop.f32.mrf.mxu0 }
 0xc7a   :  { %v1721_v15 = vadd.f32 %v1950_v43, %v1720_v36 }
 0xc7c   :  { %1724 = vst [vmem:[#allocation3] sm:$0x3] %v1721_v15 }
 0xc7d   :  { %2054 = shalt.err (!%p2051_p4)
}
 0xc7e   :  { %1735 = dma.vmem_to_hbm [thread:$0]  %s1731_s13, 32, %s1733_s26, [#allocation4]  }
 0xc81   :  { %v1722_v18 = vpop.f32.mrf.mxu0 }
 0xc82   :  { %2055 = dma.done.wait [#allocation4], 32  }
 0xc83   :  { %2056 = vsyncadd [#allocation4], 4294967264 }
 0xc84   :  { %1740 = vsyncpa [#allocation4], 1 }

</bundles_post_ra>
